<compile_context>
chip_gen: v6e
topology: v6e:2x2x1
jax: 0.10.0
libtpu: 0.0.40
codegen_flags: <defaults>
</compile_context>

<pallas_src>
import jax
import jax.numpy as jnp
from jax import lax
from jax.experimental import pallas as pl
from jax.experimental.pallas import tpu as pltpu


def _round_up(n, m):
    return -(-n // m) * m


def _char_lstm_kernel(x_ref, wih_ref, whh_ref, b_ref, wfc_ref, bfc_ref,
                      out_ref, hn_ref, cn_ref,
                      xw_scr):
    """Full LSTM recurrence + final FC in one kernel invocation.

    x_ref  : (T*B, I)      input sequence, time-major, batch sublane-padded
    wih_ref: (I, 4H)       transposed weight_ih_l0
    whh_ref: (H, 4H)       transposed weight_hh_l0
    b_ref  : (1, 4H)       bias_ih_l0 + bias_hh_l0
    wfc_ref: (H, Opad)     transposed (lane-padded) fc.weight
    bfc_ref: (1, Opad)     (lane-padded) fc.bias
    out_ref: (B, Opad)     logits = fc(output[-1])
    hn_ref : (B, H)        final hidden state h_T
    cn_ref : (B, H)        final cell state c_T
    xw_scr : (T*B, 4H)     VMEM scratch: precomputed x @ W_ih^T + b
    """
    B, H = hn_ref.shape
    TB = x_ref.shape[0]
    T = TB // B

    # (1) Hoist the input projection out of the recurrence: one MXU matmul
    # over all T*B rows, bias folded in once.
    xw_scr[...] = (jnp.dot(x_ref[...], wih_ref[...],
                           preferred_element_type=jnp.float32)
                   + b_ref[...])

    # (4) Hoist the recurrent weight read above the unrolled loop.
    whh = whh_ref[...]

    # hidden = init_hidden() -> zeros, carried in vregs.
    # TODO(synk): accept an explicit (h0, c0) input to cover the
    # `hidden is not None` branch of CharLSTM.forward.
    h = jnp.zeros((B, H), jnp.float32)
    c = jnp.zeros((B, H), jnp.float32)

    # (2)+(3) vreg-carried state, fully unrolled fixed-length recurrence.
    for t in range(T):
        gates = (xw_scr[t * B:(t + 1) * B, :]
                 + jnp.dot(h, whh, preferred_element_type=jnp.float32))
        # PyTorch gate order (i, f, g, o). With H a multiple of 128 these
        # slices are whole lane-aligned tiles (no cross-lane relayout).
        i_g = jax.nn.sigmoid(gates[:, 0 * H:1 * H])
        f_g = jax.nn.sigmoid(gates[:, 1 * H:2 * H])
        g_g = jnp.tanh(gates[:, 2 * H:3 * H])
        o_g = jax.nn.sigmoid(gates[:, 3 * H:4 * H])
        c = f_g * c + i_g * g_g
        h = o_g * jnp.tanh(c)

    # Final Linear on output[-1]; single lane-dense store per output.
    out_ref[...] = (jnp.dot(h, wfc_ref[...], preferred_element_type=jnp.float32)
                    + bfc_ref[...])
    hn_ref[...] = h
    cn_ref[...] = c


@jax.jit
def char_lstm_forward(x, w_ih, w_hh, b_ih, b_hh, w_fc, b_fc):
    """Pallas-backed CharLSTM.forward(input, hidden=None).

    Args:
      x    : (T, B, I) float32
      w_ih : (4H, I)   LSTM weight_ih_l0 (PyTorch layout)
      w_hh : (4H, H)   LSTM weight_hh_l0
      b_ih : (4H,)     bias_ih_l0
      b_hh : (4H,)     bias_hh_l0
      w_fc : (O, H)    fc.weight
      b_fc : (O,)      fc.bias
    Returns:
      (logits (B, O), (h_n (1, B, H), c_n (1, B, H)))
    """
    T, B, I = x.shape
    H4, _ = w_ih.shape
    H = H4 // 4
    O = w_fc.shape[0]

    # (5) Lane/sublane-dense padding: batch -> multiple of 8 sublanes (also
    # fills MXU rows in the hoisted projection), fc output -> multiple of 128
    # lanes (unmasked stores). Pad rows/cols are zeros; results sliced back.
    B_pad = max(8, _round_up(B, 8))
    O_pad = _round_up(O, 128)

    x_p = jnp.zeros((T, B_pad, I), jnp.float32).at[:, :B, :].set(
        x.astype(jnp.float32)).reshape(T * B_pad, I)            # (T*B, I)
    wih_t = jnp.transpose(w_ih).astype(jnp.float32)             # (I, 4H)
    whh_t = jnp.transpose(w_hh).astype(jnp.float32)             # (H, 4H)
    b = (b_ih + b_hh).reshape(1, 4 * H).astype(jnp.float32)     # (1, 4H)
    wfc_t = jnp.zeros((H, O_pad), jnp.float32).at[:, :O].set(
        jnp.transpose(w_fc).astype(jnp.float32))                # (H, Opad)
    bfc = jnp.zeros((1, O_pad), jnp.float32).at[:, :O].set(
        b_fc.reshape(1, O).astype(jnp.float32))                 # (1, Opad)

    out_shapes = (
        jax.ShapeDtypeStruct((B_pad, O_pad), jnp.float32),   # logits (padded)
        jax.ShapeDtypeStruct((B_pad, H), jnp.float32),       # h_n (padded)
        jax.ShapeDtypeStruct((B_pad, H), jnp.float32),       # c_n (padded)
    )

    vmem = pl.BlockSpec(memory_space=pltpu.MemorySpace.VMEM)

    # No grid: the whole problem (weights + sequence) is far below VMEM limits
    # at these sizes. For large B, add a "parallel" batch grid axis; for long
    # T, switch x to a T-chunked BlockSpec instead of full-VMEM residence.
    logits_p, h_p, c_p = pl.pallas_call(
        _char_lstm_kernel,
        out_shape=out_shapes,
        in_specs=[vmem] * 6,
        out_specs=(vmem, vmem, vmem),
        scratch_shapes=[
            pltpu.VMEM((T * B_pad, 4 * H), jnp.float32),  # precomputed xW + b
        ],
    )(x_p, wih_t, whh_t, b, wfc_t, bfc)

    logits = logits_p[:B, :O]
    # PyTorch returns hidden as (num_layers=1, batch, hidden).
    h_n = h_p[:B, :].reshape(1, B, H)
    c_n = c_p[:B, :].reshape(1, B, H)
    return logits, (h_n, c_n)


def _reference_forward(x, w_ih, w_hh, b_ih, b_hh, w_fc, b_fc):
    """Pure-JAX reference of the PyTorch LSTM semantics (sanity check)."""
    T, B, I = x.shape
    H = w_hh.shape[1]
    hi = lax.Precision.HIGHEST
    h = jnp.zeros((B, H), jnp.float32)
    c = jnp.zeros((B, H), jnp.float32)
    for t in range(T):
        gates = (jnp.dot(x[t], w_ih.T, precision=hi) + b_ih
                 + jnp.dot(h, w_hh.T, precision=hi) + b_hh)
        i_g = jax.nn.sigmoid(gates[:, 0 * H:1 * H])
        f_g = jax.nn.sigmoid(gates[:, 1 * H:2 * H])
        g_g = jnp.tanh(gates[:, 2 * H:3 * H])
        o_g = jax.nn.sigmoid(gates[:, 3 * H:4 * H])
        c = f_g * c + i_g * g_g
        h = o_g * jnp.tanh(c)
    logits = jnp.dot(h, w_fc.T, precision=hi) + b_fc
    return logits, (h.reshape(1, B, H), c.reshape(1, B, H))


if __name__ == "__main__":
    # Shapes consistent with the module: hidden_size=128 (as in the spec),
    # seq_len=8, batch=1 (init_hidden assumes batch=1), char vocab ~64.
    T, B, I, H, O = 8, 1, 64, 128, 64

    key = jax.random.PRNGKey(0)
    k = jax.random.split(key, 8)
    bound = 1.0 / jnp.sqrt(H)  # PyTorch LSTM/Linear default uniform bound

    x = jax.random.normal(k[0], (T, B, I), jnp.float32)
    w_ih = jax.random.uniform(k[1], (4 * H, I), jnp.float32, -bound, bound)
    w_hh = jax.random.uniform(k[2], (4 * H, H), jnp.float32, -bound, bound)
    b_ih = jax.random.uniform(k[3], (4 * H,), jnp.float32, -bound, bound)
    b_hh = jax.random.uniform(k[4], (4 * H,), jnp.float32, -bound, bound)
    w_fc = jax.random.uniform(k[5], (O, H), jnp.float32, -bound, bound)
    b_fc = jax.random.uniform(k[6], (O,), jnp.float32, -bound, bound)

    logits, (h_n, c_n) = char_lstm_forward(x, w_ih, w_hh, b_ih, b_hh, w_fc, b_fc)
    jax.block_until_ready((logits, h_n, c_n))

    ref_logits, (ref_h, ref_c) = _reference_forward(
        x, w_ih, w_hh, b_ih, b_hh, w_fc, b_fc)
    assert logits.shape == (B, O)
    assert h_n.shape == (1, B, H) and c_n.shape == (1, B, H)
    assert jnp.allclose(logits, ref_logits, atol=5e-4, rtol=5e-4), "logits mismatch"
    assert jnp.allclose(h_n, ref_h, atol=5e-4, rtol=5e-4), "h_n mismatch"
    assert jnp.allclose(c_n, ref_c, atol=5e-4, rtol=5e-4), "c_n mismatch"

    print("KERNEL_OK")
</pallas_src>

<mosaic_0001>
module attributes {stable_mosaic.version = 11 : i64} {
  func.func @_char_lstm_kernel(%arg0: memref<64x64xf32, #tpu.memory_space<vmem>>, %arg1: memref<64x512xf32, #tpu.memory_space<vmem>>, %arg2: memref<128x512xf32, #tpu.memory_space<vmem>>, %arg3: memref<1x512xf32, #tpu.memory_space<vmem>>, %arg4: memref<128x128xf32, #tpu.memory_space<vmem>>, %arg5: memref<1x128xf32, #tpu.memory_space<vmem>>, %arg6: memref<8x128xf32, #tpu.memory_space<vmem>>, %arg7: memref<8x128xf32, #tpu.memory_space<vmem>>, %arg8: memref<8x128xf32, #tpu.memory_space<vmem>>, %arg9: memref<64x512xf32, #tpu.memory_space<vmem>>) attributes {dimension_semantics = [], scalar_prefetch = 0 : i64, scratch_operands = 1 : i64, tpu.core_type = #tpu.core_type<tc>} {
    %c0 = arith.constant 0 : index
    %c0_0 = arith.constant 0 : index
    %0 = vector.load %arg0[%c0, %c0_0] : memref<64x64xf32, #tpu.memory_space<vmem>>, vector<64x64xf32>
    %c0_1 = arith.constant 0 : index
    %c0_2 = arith.constant 0 : index
    %1 = vector.load %arg1[%c0_1, %c0_2] : memref<64x512xf32, #tpu.memory_space<vmem>>, vector<64x512xf32>
    %cst = arith.constant dense<0.000000e+00> : vector<64x512xf32>
    %2 = tpu.matmul %0, %1, %cst {dimension_numbers = #tpu.dot_dimension_numbers<[1], [0], [0], [1], [0, 0, 1, 1], [], []>} : vector<64x64xf32>, vector<64x512xf32>, vector<64x512xf32> -> vector<64x512xf32>
    %c0_3 = arith.constant 0 : index
    %c0_4 = arith.constant 0 : index
    %3 = vector.load %arg3[%c0_3, %c0_4] : memref<1x512xf32, #tpu.memory_space<vmem>>, vector<1x512xf32>
    %4 = vector.broadcast %3 : vector<1x512xf32> to vector<64x512xf32>
    %5 = arith.addf %2, %4 : vector<64x512xf32>
    %c0_5 = arith.constant 0 : index
    %c0_6 = arith.constant 0 : index
    %6 = vector.load %arg9[%c0_5, %c0_6] : memref<64x512xf32, #tpu.memory_space<vmem>>, vector<64x512xf32>
    tpu.vector_store %arg9[%c0_5, %c0_6], %5 {strides = array<i32>} : memref<64x512xf32, #tpu.memory_space<vmem>>, vector<64x512xf32>,
    %c0_7 = arith.constant 0 : index
    %c0_8 = arith.constant 0 : index
    %7 = vector.load %arg2[%c0_7, %c0_8] : memref<128x512xf32, #tpu.memory_space<vmem>>, vector<128x512xf32>
    %cst_9 = arith.constant 0.000000e+00 : f32
    %8 = vector.broadcast %cst_9 : f32 to vector<8x128xf32>
    %cst_10 = arith.constant 0.000000e+00 : f32
    %9 = vector.broadcast %cst_10 : f32 to vector<8x128xf32>
    %c0_11 = arith.constant 0 : index
    %c0_12 = arith.constant 0 : index
    %10 = vector.load %arg9[%c0_11, %c0_12] : memref<64x512xf32, #tpu.memory_space<vmem>>, vector<8x512xf32>
    %cst_13 = arith.constant dense<0.000000e+00> : vector<8x512xf32>
    %11 = tpu.matmul %8, %7, %cst_13 {dimension_numbers = #tpu.dot_dimension_numbers<[1], [0], [0], [1], [0, 0, 1, 1], [], []>} : vector<8x128xf32>, vector<128x512xf32>, vector<8x512xf32> -> vector<8x512xf32>
    %12 = arith.addf %10, %11 : vector<8x512xf32>
    %13 = vector.extract_strided_slice %12 {offsets = [0, 0], sizes = [8, 128], strides = [1, 1]} : vector<8x512xf32> to vector<8x128xf32>
    %14 = arith.negf %13 : vector<8x128xf32>
    %15 = math.exp %14 : vector<8x128xf32>
    %cst_14 = arith.constant 1.000000e+00 : f32
    %16 = vector.broadcast %cst_14 : f32 to vector<8x128xf32>
    %17 = arith.addf %16, %15 : vector<8x128xf32>
    %18 = arith.divf %16, %17 : vector<8x128xf32>
    %19 = vector.extract_strided_slice %12 {offsets = [0, 128], sizes = [8, 128], strides = [1, 1]} : vector<8x512xf32> to vector<8x128xf32>
    %20 = arith.negf %19 : vector<8x128xf32>
    %21 = math.exp %20 : vector<8x128xf32>
    %cst_15 = arith.constant 1.000000e+00 : f32
    %22 = vector.broadcast %cst_15 : f32 to vector<8x128xf32>
    %23 = arith.addf %22, %21 : vector<8x128xf32>
    %24 = arith.divf %22, %23 : vector<8x128xf32>
    %25 = vector.extract_strided_slice %12 {offsets = [0, 256], sizes = [8, 128], strides = [1, 1]} : vector<8x512xf32> to vector<8x128xf32>
    %26 = math.tanh %25 : vector<8x128xf32>
    %27 = vector.extract_strided_slice %12 {offsets = [0, 384], sizes = [8, 128], strides = [1, 1]} : vector<8x512xf32> to vector<8x128xf32>
    %28 = arith.negf %27 : vector<8x128xf32>
    %29 = math.exp %28 : vector<8x128xf32>
    %cst_16 = arith.constant 1.000000e+00 : f32
    %30 = vector.broadcast %cst_16 : f32 to vector<8x128xf32>
    %31 = arith.addf %30, %29 : vector<8x128xf32>
    %32 = arith.divf %30, %31 : vector<8x128xf32>
    %33 = arith.mulf %24, %9 : vector<8x128xf32>
    %34 = arith.mulf %18, %26 : vector<8x128xf32>
    %35 = arith.addf %33, %34 : vector<8x128xf32>
    %36 = math.tanh %35 : vector<8x128xf32>
    %37 = arith.mulf %32, %36 : vector<8x128xf32>
    %c8 = arith.constant 8 : index
    %c0_17 = arith.constant 0 : index
    %38 = vector.load %arg9[%c8, %c0_17] : memref<64x512xf32, #tpu.memory_space<vmem>>, vector<8x512xf32>
    %cst_18 = arith.constant dense<0.000000e+00> : vector<8x512xf32>
    %39 = tpu.matmul %37, %7, %cst_18 {dimension_numbers = #tpu.dot_dimension_numbers<[1], [0], [0], [1], [0, 0, 1, 1], [], []>} : vector<8x128xf32>, vector<128x512xf32>, vector<8x512xf32> -> vector<8x512xf32>
    %40 = arith.addf %38, %39 : vector<8x512xf32>
    %41 = vector.extract_strided_slice %40 {offsets = [0, 0], sizes = [8, 128], strides = [1, 1]} : vector<8x512xf32> to vector<8x128xf32>
    %42 = arith.negf %41 : vector<8x128xf32>
    %43 = math.exp %42 : vector<8x128xf32>
    %cst_19 = arith.constant 1.000000e+00 : f32
    %44 = vector.broadcast %cst_19 : f32 to vector<8x128xf32>
    %45 = arith.addf %44, %43 : vector<8x128xf32>
    %46 = arith.divf %44, %45 : vector<8x128xf32>
    %47 = vector.extract_strided_slice %40 {offsets = [0, 128], sizes = [8, 128], strides = [1, 1]} : vector<8x512xf32> to vector<8x128xf32>
    %48 = arith.negf %47 : vector<8x128xf32>
    %49 = math.exp %48 : vector<8x128xf32>
    %cst_20 = arith.constant 1.000000e+00 : f32
    %50 = vector.broadcast %cst_20 : f32 to vector<8x128xf32>
    %51 = arith.addf %50, %49 : vector<8x128xf32>
    %52 = arith.divf %50, %51 : vector<8x128xf32>
    %53 = vector.extract_strided_slice %40 {offsets = [0, 256], sizes = [8, 128], strides = [1, 1]} : vector<8x512xf32> to vector<8x128xf32>
    %54 = math.tanh %53 : vector<8x128xf32>
    %55 = vector.extract_strided_slice %40 {offsets = [0, 384], sizes = [8, 128], strides = [1, 1]} : vector<8x512xf32> to vector<8x128xf32>
    %56 = arith.negf %55 : vector<8x128xf32>
    %57 = math.exp %56 : vector<8x128xf32>
    %cst_21 = arith.constant 1.000000e+00 : f32
    %58 = vector.broadcast %cst_21 : f32 to vector<8x128xf32>
    %59 = arith.addf %58, %57 : vector<8x128xf32>
    %60 = arith.divf %58, %59 : vector<8x128xf32>
    %61 = arith.mulf %52, %35 : vector<8x128xf32>
    %62 = arith.mulf %46, %54 : vector<8x128xf32>
    %63 = arith.addf %61, %62 : vector<8x128xf32>
    %64 = math.tanh %63 : vector<8x128xf32>
    %65 = arith.mulf %60, %64 : vector<8x128xf32>
    %c16 = arith.constant 16 : index
    %c0_22 = arith.constant 0 : index
    %66 = vector.load %arg9[%c16, %c0_22] : memref<64x512xf32, #tpu.memory_space<vmem>>, vector<8x512xf32>
    %cst_23 = arith.constant dense<0.000000e+00> : vector<8x512xf32>
    %67 = tpu.matmul %65, %7, %cst_23 {dimension_numbers = #tpu.dot_dimension_numbers<[1], [0], [0], [1], [0, 0, 1, 1], [], []>} : vector<8x128xf32>, vector<128x512xf32>, vector<8x512xf32> -> vector<8x512xf32>
    %68 = arith.addf %66, %67 : vector<8x512xf32>
    %69 = vector.extract_strided_slice %68 {offsets = [0, 0], sizes = [8, 128], strides = [1, 1]} : vector<8x512xf32> to vector<8x128xf32>
    %70 = arith.negf %69 : vector<8x128xf32>
    %71 = math.exp %70 : vector<8x128xf32>
    %cst_24 = arith.constant 1.000000e+00 : f32
    %72 = vector.broadcast %cst_24 : f32 to vector<8x128xf32>
    %73 = arith.addf %72, %71 : vector<8x128xf32>
    %74 = arith.divf %72, %73 : vector<8x128xf32>
    %75 = vector.extract_strided_slice %68 {offsets = [0, 128], sizes = [8, 128], strides = [1, 1]} : vector<8x512xf32> to vector<8x128xf32>
    %76 = arith.negf %75 : vector<8x128xf32>
    %77 = math.exp %76 : vector<8x128xf32>
    %cst_25 = arith.constant 1.000000e+00 : f32
    %78 = vector.broadcast %cst_25 : f32 to vector<8x128xf32>
    %79 = arith.addf %78, %77 : vector<8x128xf32>
    %80 = arith.divf %78, %79 : vector<8x128xf32>
    %81 = vector.extract_strided_slice %68 {offsets = [0, 256], sizes = [8, 128], strides = [1, 1]} : vector<8x512xf32> to vector<8x128xf32>
    %82 = math.tanh %81 : vector<8x128xf32>
    %83 = vector.extract_strided_slice %68 {offsets = [0, 384], sizes = [8, 128], strides = [1, 1]} : vector<8x512xf32> to vector<8x128xf32>
    %84 = arith.negf %83 : vector<8x128xf32>
    %85 = math.exp %84 : vector<8x128xf32>
    %cst_26 = arith.constant 1.000000e+00 : f32
    %86 = vector.broadcast %cst_26 : f32 to vector<8x128xf32>
    %87 = arith.addf %86, %85 : vector<8x128xf32>
    %88 = arith.divf %86, %87 : vector<8x128xf32>
    %89 = arith.mulf %80, %63 : vector<8x128xf32>
    %90 = arith.mulf %74, %82 : vector<8x128xf32>
    %91 = arith.addf %89, %90 : vector<8x128xf32>
    %92 = math.tanh %91 : vector<8x128xf32>
    %93 = arith.mulf %88, %92 : vector<8x128xf32>
    %c24 = arith.constant 24 : index
    %c0_27 = arith.constant 0 : index
    %94 = vector.load %arg9[%c24, %c0_27] : memref<64x512xf32, #tpu.memory_space<vmem>>, vector<8x512xf32>
    %cst_28 = arith.constant dense<0.000000e+00> : vector<8x512xf32>
    %95 = tpu.matmul %93, %7, %cst_28 {dimension_numbers = #tpu.dot_dimension_numbers<[1], [0], [0], [1], [0, 0, 1, 1], [], []>} : vector<8x128xf32>, vector<128x512xf32>, vector<8x512xf32> -> vector<8x512xf32>
    %96 = arith.addf %94, %95 : vector<8x512xf32>
    %97 = vector.extract_strided_slice %96 {offsets = [0, 0], sizes = [8, 128], strides = [1, 1]} : vector<8x512xf32> to vector<8x128xf32>
    %98 = arith.negf %97 : vector<8x128xf32>
    %99 = math.exp %98 : vector<8x128xf32>
    %cst_29 = arith.constant 1.000000e+00 : f32
    %100 = vector.broadcast %cst_29 : f32 to vector<8x128xf32>
    %101 = arith.addf %100, %99 : vector<8x128xf32>
    %102 = arith.divf %100, %101 : vector<8x128xf32>
    %103 = vector.extract_strided_slice %96 {offsets = [0, 128], sizes = [8, 128], strides = [1, 1]} : vector<8x512xf32> to vector<8x128xf32>
    %104 = arith.negf %103 : vector<8x128xf32>
    %105 = math.exp %104 : vector<8x128xf32>
    %cst_30 = arith.constant 1.000000e+00 : f32
    %106 = vector.broadcast %cst_30 : f32 to vector<8x128xf32>
    %107 = arith.addf %106, %105 : vector<8x128xf32>
    %108 = arith.divf %106, %107 : vector<8x128xf32>
    %109 = vector.extract_strided_slice %96 {offsets = [0, 256], sizes = [8, 128], strides = [1, 1]} : vector<8x512xf32> to vector<8x128xf32>
    %110 = math.tanh %109 : vector<8x128xf32>
    %111 = vector.extract_strided_slice %96 {offsets = [0, 384], sizes = [8, 128], strides = [1, 1]} : vector<8x512xf32> to vector<8x128xf32>
    %112 = arith.negf %111 : vector<8x128xf32>
    %113 = math.exp %112 : vector<8x128xf32>
    %cst_31 = arith.constant 1.000000e+00 : f32
    %114 = vector.broadcast %cst_31 : f32 to vector<8x128xf32>
    %115 = arith.addf %114, %113 : vector<8x128xf32>
    %116 = arith.divf %114, %115 : vector<8x128xf32>
    %117 = arith.mulf %108, %91 : vector<8x128xf32>
    %118 = arith.mulf %102, %110 : vector<8x128xf32>
    %119 = arith.addf %117, %118 : vector<8x128xf32>
    %120 = math.tanh %119 : vector<8x128xf32>
    %121 = arith.mulf %116, %120 : vector<8x128xf32>
    %c32 = arith.constant 32 : index
    %c0_32 = arith.constant 0 : index
    %122 = vector.load %arg9[%c32, %c0_32] : memref<64x512xf32, #tpu.memory_space<vmem>>, vector<8x512xf32>
    %cst_33 = arith.constant dense<0.000000e+00> : vector<8x512xf32>
    %123 = tpu.matmul %121, %7, %cst_33 {dimension_numbers = #tpu.dot_dimension_numbers<[1], [0], [0], [1], [0, 0, 1, 1], [], []>} : vector<8x128xf32>, vector<128x512xf32>, vector<8x512xf32> -> vector<8x512xf32>
    %124 = arith.addf %122, %123 : vector<8x512xf32>
    %125 = vector.extract_strided_slice %124 {offsets = [0, 0], sizes = [8, 128], strides = [1, 1]} : vector<8x512xf32> to vector<8x128xf32>
    %126 = arith.negf %125 : vector<8x128xf32>
    %127 = math.exp %126 : vector<8x128xf32>
    %cst_34 = arith.constant 1.000000e+00 : f32
    %128 = vector.broadcast %cst_34 : f32 to vector<8x128xf32>
    %129 = arith.addf %128, %127 : vector<8x128xf32>
    %130 = arith.divf %128, %129 : vector<8x128xf32>
    %131 = vector.extract_strided_slice %124 {offsets = [0, 128], sizes = [8, 128], strides = [1, 1]} : vector<8x512xf32> to vector<8x128xf32>
    %132 = arith.negf %131 : vector<8x128xf32>
    %133 = math.exp %132 : vector<8x128xf32>
    %cst_35 = arith.constant 1.000000e+00 : f32
    %134 = vector.broadcast %cst_35 : f32 to vector<8x128xf32>
    %135 = arith.addf %134, %133 : vector<8x128xf32>
    %136 = arith.divf %134, %135 : vector<8x128xf32>
    %137 = vector.extract_strided_slice %124 {offsets = [0, 256], sizes = [8, 128], strides = [1, 1]} : vector<8x512xf32> to vector<8x128xf32>
    %138 = math.tanh %137 : vector<8x128xf32>
    %139 = vector.extract_strided_slice %124 {offsets = [0, 384], sizes = [8, 128], strides = [1, 1]} : vector<8x512xf32> to vector<8x128xf32>
    %140 = arith.negf %139 : vector<8x128xf32>
    %141 = math.exp %140 : vector<8x128xf32>
    %cst_36 = arith.constant 1.000000e+00 : f32
    %142 = vector.broadcast %cst_36 : f32 to vector<8x128xf32>
    %143 = arith.addf %142, %141 : vector<8x128xf32>
    %144 = arith.divf %142, %143 : vector<8x128xf32>
    %145 = arith.mulf %136, %119 : vector<8x128xf32>
    %146 = arith.mulf %130, %138 : vector<8x128xf32>
    %147 = arith.addf %145, %146 : vector<8x128xf32>
    %148 = math.tanh %147 : vector<8x128xf32>
    %149 = arith.mulf %144, %148 : vector<8x128xf32>
    %c40 = arith.constant 40 : index
    %c0_37 = arith.constant 0 : index
    %150 = vector.load %arg9[%c40, %c0_37] : memref<64x512xf32, #tpu.memory_space<vmem>>, vector<8x512xf32>
    %cst_38 = arith.constant dense<0.000000e+00> : vector<8x512xf32>
    %151 = tpu.matmul %149, %7, %cst_38 {dimension_numbers = #tpu.dot_dimension_numbers<[1], [0], [0], [1], [0, 0, 1, 1], [], []>} : vector<8x128xf32>, vector<128x512xf32>, vector<8x512xf32> -> vector<8x512xf32>
    %152 = arith.addf %150, %151 : vector<8x512xf32>
    %153 = vector.extract_strided_slice %152 {offsets = [0, 0], sizes = [8, 128], strides = [1, 1]} : vector<8x512xf32> to vector<8x128xf32>
    %154 = arith.negf %153 : vector<8x128xf32>
    %155 = math.exp %154 : vector<8x128xf32>
    %cst_39 = arith.constant 1.000000e+00 : f32
    %156 = vector.broadcast %cst_39 : f32 to vector<8x128xf32>
    %157 = arith.addf %156, %155 : vector<8x128xf32>
    %158 = arith.divf %156, %157 : vector<8x128xf32>
    %159 = vector.extract_strided_slice %152 {offsets = [0, 128], sizes = [8, 128], strides = [1, 1]} : vector<8x512xf32> to vector<8x128xf32>
    %160 = arith.negf %159 : vector<8x128xf32>
    %161 = math.exp %160 : vector<8x128xf32>
    %cst_40 = arith.constant 1.000000e+00 : f32
    %162 = vector.broadcast %cst_40 : f32 to vector<8x128xf32>
    %163 = arith.addf %162, %161 : vector<8x128xf32>
    %164 = arith.divf %162, %163 : vector<8x128xf32>
    %165 = vector.extract_strided_slice %152 {offsets = [0, 256], sizes = [8, 128], strides = [1, 1]} : vector<8x512xf32> to vector<8x128xf32>
    %166 = math.tanh %165 : vector<8x128xf32>
    %167 = vector.extract_strided_slice %152 {offsets = [0, 384], sizes = [8, 128], strides = [1, 1]} : vector<8x512xf32> to vector<8x128xf32>
    %168 = arith.negf %167 : vector<8x128xf32>
    %169 = math.exp %168 : vector<8x128xf32>
    %cst_41 = arith.constant 1.000000e+00 : f32
    %170 = vector.broadcast %cst_41 : f32 to vector<8x128xf32>
    %171 = arith.addf %170, %169 : vector<8x128xf32>
    %172 = arith.divf %170, %171 : vector<8x128xf32>
    %173 = arith.mulf %164, %147 : vector<8x128xf32>
    %174 = arith.mulf %158, %166 : vector<8x128xf32>
    %175 = arith.addf %173, %174 : vector<8x128xf32>
    %176 = math.tanh %175 : vector<8x128xf32>
    %177 = arith.mulf %172, %176 : vector<8x128xf32>
    %c48 = arith.constant 48 : index
    %c0_42 = arith.constant 0 : index
    %178 = vector.load %arg9[%c48, %c0_42] : memref<64x512xf32, #tpu.memory_space<vmem>>, vector<8x512xf32>
    %cst_43 = arith.constant dense<0.000000e+00> : vector<8x512xf32>
    %179 = tpu.matmul %177, %7, %cst_43 {dimension_numbers = #tpu.dot_dimension_numbers<[1], [0], [0], [1], [0, 0, 1, 1], [], []>} : vector<8x128xf32>, vector<128x512xf32>, vector<8x512xf32> -> vector<8x512xf32>
    %180 = arith.addf %178, %179 : vector<8x512xf32>
    %181 = vector.extract_strided_slice %180 {offsets = [0, 0], sizes = [8, 128], strides = [1, 1]} : vector<8x512xf32> to vector<8x128xf32>
    %182 = arith.negf %181 : vector<8x128xf32>
    %183 = math.exp %182 : vector<8x128xf32>
    %cst_44 = arith.constant 1.000000e+00 : f32
    %184 = vector.broadcast %cst_44 : f32 to vector<8x128xf32>
    %185 = arith.addf %184, %183 : vector<8x128xf32>
    %186 = arith.divf %184, %185 : vector<8x128xf32>
    %187 = vector.extract_strided_slice %180 {offsets = [0, 128], sizes = [8, 128], strides = [1, 1]} : vector<8x512xf32> to vector<8x128xf32>
    %188 = arith.negf %187 : vector<8x128xf32>
    %189 = math.exp %188 : vector<8x128xf32>
    %cst_45 = arith.constant 1.000000e+00 : f32
    %190 = vector.broadcast %cst_45 : f32 to vector<8x128xf32>
    %191 = arith.addf %190, %189 : vector<8x128xf32>
    %192 = arith.divf %190, %191 : vector<8x128xf32>
    %193 = vector.extract_strided_slice %180 {offsets = [0, 256], sizes = [8, 128], strides = [1, 1]} : vector<8x512xf32> to vector<8x128xf32>
    %194 = math.tanh %193 : vector<8x128xf32>
    %195 = vector.extract_strided_slice %180 {offsets = [0, 384], sizes = [8, 128], strides = [1, 1]} : vector<8x512xf32> to vector<8x128xf32>
    %196 = arith.negf %195 : vector<8x128xf32>
    %197 = math.exp %196 : vector<8x128xf32>
    %cst_46 = arith.constant 1.000000e+00 : f32
    %198 = vector.broadcast %cst_46 : f32 to vector<8x128xf32>
    %199 = arith.addf %198, %197 : vector<8x128xf32>
    %200 = arith.divf %198, %199 : vector<8x128xf32>
    %201 = arith.mulf %192, %175 : vector<8x128xf32>
    %202 = arith.mulf %186, %194 : vector<8x128xf32>
    %203 = arith.addf %201, %202 : vector<8x128xf32>
    %204 = math.tanh %203 : vector<8x128xf32>
    %205 = arith.mulf %200, %204 : vector<8x128xf32>
    %c56 = arith.constant 56 : index
    %c0_47 = arith.constant 0 : index
    %206 = vector.load %arg9[%c56, %c0_47] : memref<64x512xf32, #tpu.memory_space<vmem>>, vector<8x512xf32>
    %cst_48 = arith.constant dense<0.000000e+00> : vector<8x512xf32>
    %207 = tpu.matmul %205, %7, %cst_48 {dimension_numbers = #tpu.dot_dimension_numbers<[1], [0], [0], [1], [0, 0, 1, 1], [], []>} : vector<8x128xf32>, vector<128x512xf32>, vector<8x512xf32> -> vector<8x512xf32>
    %208 = arith.addf %206, %207 : vector<8x512xf32>
    %209 = vector.extract_strided_slice %208 {offsets = [0, 0], sizes = [8, 128], strides = [1, 1]} : vector<8x512xf32> to vector<8x128xf32>
    %210 = arith.negf %209 : vector<8x128xf32>
    %211 = math.exp %210 : vector<8x128xf32>
    %cst_49 = arith.constant 1.000000e+00 : f32
    %212 = vector.broadcast %cst_49 : f32 to vector<8x128xf32>
    %213 = arith.addf %212, %211 : vector<8x128xf32>
    %214 = arith.divf %212, %213 : vector<8x128xf32>
    %215 = vector.extract_strided_slice %208 {offsets = [0, 128], sizes = [8, 128], strides = [1, 1]} : vector<8x512xf32> to vector<8x128xf32>
    %216 = arith.negf %215 : vector<8x128xf32>
    %217 = math.exp %216 : vector<8x128xf32>
    %cst_50 = arith.constant 1.000000e+00 : f32
    %218 = vector.broadcast %cst_50 : f32 to vector<8x128xf32>
    %219 = arith.addf %218, %217 : vector<8x128xf32>
    %220 = arith.divf %218, %219 : vector<8x128xf32>
    %221 = vector.extract_strided_slice %208 {offsets = [0, 256], sizes = [8, 128], strides = [1, 1]} : vector<8x512xf32> to vector<8x128xf32>
    %222 = math.tanh %221 : vector<8x128xf32>
    %223 = vector.extract_strided_slice %208 {offsets = [0, 384], sizes = [8, 128], strides = [1, 1]} : vector<8x512xf32> to vector<8x128xf32>
    %224 = arith.negf %223 : vector<8x128xf32>
    %225 = math.exp %224 : vector<8x128xf32>
    %cst_51 = arith.constant 1.000000e+00 : f32
    %226 = vector.broadcast %cst_51 : f32 to vector<8x128xf32>
    %227 = arith.addf %226, %225 : vector<8x128xf32>
    %228 = arith.divf %226, %227 : vector<8x128xf32>
    %229 = arith.mulf %220, %203 : vector<8x128xf32>
    %230 = arith.mulf %214, %222 : vector<8x128xf32>
    %231 = arith.addf %229, %230 : vector<8x128xf32>
    %232 = math.tanh %231 : vector<8x128xf32>
    %233 = arith.mulf %228, %232 : vector<8x128xf32>
    %c0_52 = arith.constant 0 : index
    %c0_53 = arith.constant 0 : index
    %234 = vector.load %arg4[%c0_52, %c0_53] : memref<128x128xf32, #tpu.memory_space<vmem>>, vector<128x128xf32>
    %cst_54 = arith.constant dense<0.000000e+00> : vector<8x128xf32>
    %235 = tpu.matmul %233, %234, %cst_54 {dimension_numbers = #tpu.dot_dimension_numbers<[1], [0], [0], [1], [0, 0, 1, 1], [], []>} : vector<8x128xf32>, vector<128x128xf32>, vector<8x128xf32> -> vector<8x128xf32>
    %c0_55 = arith.constant 0 : index
    %c0_56 = arith.constant 0 : index
    %236 = vector.load %arg5[%c0_55, %c0_56] : memref<1x128xf32, #tpu.memory_space<vmem>>, vector<1x128xf32>
    %237 = vector.broadcast %236 : vector<1x128xf32> to vector<8x128xf32>
    %238 = arith.addf %235, %237 : vector<8x128xf32>
    %c0_57 = arith.constant 0 : index
    %c0_58 = arith.constant 0 : index
    %239 = vector.load %arg6[%c0_57, %c0_58] : memref<8x128xf32, #tpu.memory_space<vmem>>, vector<8x128xf32>
    tpu.vector_store %arg6[%c0_57, %c0_58], %238 {strides = array<i32>} : memref<8x128xf32, #tpu.memory_space<vmem>>, vector<8x128xf32>,
    %c0_59 = arith.constant 0 : index
    %c0_60 = arith.constant 0 : index
    %240 = vector.load %arg7[%c0_59, %c0_60] : memref<8x128xf32, #tpu.memory_space<vmem>>, vector<8x128xf32>
    tpu.vector_store %arg7[%c0_59, %c0_60], %233 {strides = array<i32>} : memref<8x128xf32, #tpu.memory_space<vmem>>, vector<8x128xf32>,
    %c0_61 = arith.constant 0 : index
    %c0_62 = arith.constant 0 : index
    %241 = vector.load %arg8[%c0_61, %c0_62] : memref<8x128xf32, #tpu.memory_space<vmem>>, vector<8x128xf32>
    tpu.vector_store %arg8[%c0_61, %c0_62], %231 {strides = array<i32>} : memref<8x128xf32, #tpu.memory_space<vmem>>, vector<8x128xf32>,
    return
  }
}

</mosaic_0001>

<bundles_post_ra>
// kernel: char_lstm_forward.1
= control target key start
LH: loop header
LB: loop body
LE: loop exit
PB: predicated region body
PF: predicated region fallthrough
CT: control target
= control target key end

     0   :  { %v3824_v3 = vmov 0.0   ;;  %vm88_vm0 = vcmask 523264   ;;  %vm2223_vm1 = vmmov 0   ;;  %s3815_s1 = inlined_call_operand.vmem [shape: f32[64,512], index: 1, kind: input, shape index: {}]   ;;  %s3816_s0 = inlined_call_operand.vmem [shape: f32[64,64], index: 0, kind: input, shape index: {}]   ;;  %s3817_s2 = inlined_call_operand.vmem [shape: f32[128,512], index: 2, kind: input, shape index: {}]   ;;  %s3818_s3 = inlined_call_operand.vmem [shape: f32[1,512], index: 3, kind: input, shape index: {}]   ;;  %s3819_s4 = inlined_call_operand.vmem [shape: f32[128,128], index: 4, kind: input, shape index: {}]   ;;  %s3820_s8 = inlined_call_operand.vmem [shape: f32[8,128], index: 8, kind: output, shape index: {2}]   ;;  %s3821_s7 = inlined_call_operand.vmem [shape: f32[8,128], index: 7, kind: output, shape index: {1}]   ;;  %s3822_s5 = inlined_call_operand.vmem [shape: f32[1,128], index: 5, kind: input, shape index: {}]   ;;  %s3823_s6 = inlined_call_operand.vmem [shape: f32[8,128], index: 6, kind: output, shape index: {0}]  }
   0x1   :  { %v63_v0 = vld [vmem:[%s3815_s1 + $0xe8] sm:$0xff]  ;;  %v65_v1 = vld [vmem:[%s3815_s1 + $0xf8] sm:$0xff]  ;;  %v62_v2 = vld [vmem:[%s3815_s1 + $0xe0] sm:$0xff]  ;;  %177 = vmatprep.mubr.f32.mxu0 %v3824_v3  ;;  %290 = vmatprep.mubr.f32.mxu1 %v3824_v3 }
   0x2   :  { %129 = vmatprep.subr.mxu0 %v63_v0  ;;  %242 = vmatprep.subr.mxu1 %v65_v1  ;;  %v64_v4 = vld [vmem:[%s3815_s1 + $0xf0] sm:$0xff]  ;;  %v59_v5 = vld [vmem:[%s3815_s1 + $0xc8] sm:$0xff]  ;;  %v61_v6 = vld [vmem:[%s3815_s1 + $0xd8] sm:$0xff] }
   0x3   :  { %130 = vmatpush1.msra.mxu0 %v62_v2  ;;  %243 = vmatpush1.msra.mxu1 %v64_v4  ;;  %v58_v7 = vld [vmem:[%s3815_s1 + $0xc0] sm:$0xff]  ;;  %v60_v8 = vld [vmem:[%s3815_s1 + $0xd0] sm:$0xff]  ;;  %v55_v9 = vld [vmem:[%s3815_s1 + $0xa8] sm:$0xff] }
   0x4   :  { %131 = vmatprep.subr.mxu0 %v59_v5  ;;  %244 = vmatprep.subr.mxu1 %v61_v6  ;;  %v57_v10 = vld [vmem:[%s3815_s1 + $0xb8] sm:$0xff]  ;;  %v54_v11 = vld [vmem:[%s3815_s1 + $0xa0] sm:$0xff]  ;;  %v56_v12 = vld [vmem:[%s3815_s1 + $0xb0] sm:$0xff] }
   0x5   :  { %132 = vmatpush1.msra.mxu0 %v58_v7  ;;  %245 = vmatpush1.msra.mxu1 %v60_v8  ;;  %v51_v13 = vld [vmem:[%s3815_s1 + $0x88] sm:$0xff]  ;;  %v53_v14 = vld [vmem:[%s3815_s1 + $0x98] sm:$0xff]  ;;  %v50_v15 = vld [vmem:[%s3815_s1 + $0x80] sm:$0xff] }
   0x6   :  { %133 = vmatprep.subr.mxu0 %v55_v9  ;;  %246 = vmatprep.subr.mxu1 %v57_v10  ;;  %v52_v16 = vld [vmem:[%s3815_s1 + $0x90] sm:$0xff]  ;;  %v47_v17 = vld [vmem:[%s3815_s1 + $0x68] sm:$0xff]  ;;  %v49_v18 = vld [vmem:[%s3815_s1 + $0x78] sm:$0xff] }
   0x7   :  { %134 = vmatpush1.msra.mxu0 %v54_v11  ;;  %247 = vmatpush1.msra.mxu1 %v56_v12  ;;  %v46_v19 = vld [vmem:[%s3815_s1 + $0x60] sm:$0xff]  ;;  %v48_v20 = vld [vmem:[%s3815_s1 + $0x70] sm:$0xff]  ;;  %v43_v21 = vld [vmem:[%s3815_s1 + $0x48] sm:$0xff] }
   0x8   :  { %135 = vmatprep.subr.mxu0 %v51_v13  ;;  %248 = vmatprep.subr.mxu1 %v53_v14  ;;  %v45_v22 = vld [vmem:[%s3815_s1 + $0x58] sm:$0xff]  ;;  %v42_v23 = vld [vmem:[%s3815_s1 + $0x40] sm:$0xff]  ;;  %v44_v24 = vld [vmem:[%s3815_s1 + $0x50] sm:$0xff] }
   0x9   :  { %136 = vmatpush1.msra.mxu0 %v50_v15  ;;  %249 = vmatpush1.msra.mxu1 %v52_v16  ;;  %v39_v25 = vld [vmem:[%s3815_s1 + $0x28] sm:$0xff]  ;;  %v41_v26 = vld [vmem:[%s3815_s1 + $0x38] sm:$0xff]  ;;  %v38_v27 = vld [vmem:[%s3815_s1 + $0x20] sm:$0xff] }
   0xa   :  { %137 = vmatprep.subr.mxu0 %v47_v17  ;;  %250 = vmatprep.subr.mxu1 %v49_v18  ;;  %v40_v28 = vld [vmem:[%s3815_s1 + $0x30] sm:$0xff]  ;;  %v35_v29 = vld [vmem:[%s3815_s1 + $0x8] sm:$0xff]  ;;  %v37_v30 = vld [vmem:[%s3815_s1 + $0x18] sm:$0xff] }
   0xb   :  { %138 = vmatpush1.msra.mxu0 %v46_v19  ;;  %251 = vmatpush1.msra.mxu1 %v48_v20  ;;  %v34_v31 = vld [vmem:[%s3815_s1] sm:$0xff]  ;;  %v36_v32 = vld [vmem:[%s3815_s1 + $0x10] sm:$0xff]  ;;  %v2373_v34 = vld [vmem:[%s3817_s2 + $0x1e8] sm:$0xff] }
   0xc   :  { %139 = vmatprep.subr.mxu0 %v43_v21  ;;  %252 = vmatprep.subr.mxu1 %v45_v22  ;;  %v26_v33 = vld [vmem:[%s3816_s0] sm:$0xff]  ;;  %3912 = vst [vmem:[#allocation3_spill] sm:$0xff] %v2373_v34  ;;  %v2378_v35 = vld [vmem:[%s3817_s2 + $0x1f8] sm:$0xff]  ;;  %v2388_v37 = vld [vmem:[%s3817_s2 + $0x1f0] sm:$0xff] }
   0xd   :  { %140 = vmatpush1.msra.mxu0 %v42_v23  ;;  %253 = vmatpush1.msra.mxu1 %v44_v24  ;;  %3913 = vst [vmem:[#allocation4_spill] sm:$0xff] %v2378_v35  ;;  %v2383_v36 = vld [vmem:[%s3817_s2 + $0x1e0] sm:$0xff]  ;;  %v2395_v38 = vld [vmem:[%s3817_s2 + $0x1c8] sm:$0xff]  ;;  %v2400_v39 = vld [vmem:[%s3817_s2 + $0x1d8] sm:$0xff] }
   0xe   :  { %141 = vmatprep.subr.mxu0 %v39_v25  ;;  %254 = vmatprep.subr.mxu1 %v41_v26  ;;  %v2409_v40 = vld [vmem:[%s3817_s2 + $0x1c0] sm:$0xff]  ;;  %v2414_v41 = vld [vmem:[%s3817_s2 + $0x1d0] sm:$0xff]  ;;  %v27_v42 = vld [vmem:[%s3816_s0 + $0x8] sm:$0xff] }
   0xf   :  { %142 = vmatpush1.msra.mxu0 %v38_v27  ;;  %255 = vmatpush1.msra.mxu1 %v40_v28  ;;  %v2426_v43 = vld [vmem:[%s3817_s2 + $0x1a8] sm:$0xff]  ;;  %v2431_v44 = vld [vmem:[%s3817_s2 + $0x1b8] sm:$0xff]  ;;  %v2438_v45 = vld [vmem:[%s3817_s2 + $0x1a0] sm:$0xff] }
  0x10   :  { %143 = vmatprep.subr.mxu0 %v35_v29  ;;  %256 = vmatprep.subr.mxu1 %v37_v30  ;;  %v2443_v46 = vld [vmem:[%s3817_s2 + $0x1b0] sm:$0xff]  ;;  %v2450_v47 = vld [vmem:[%s3817_s2 + $0x188] sm:$0xff]  ;;  %v2455_v48 = vld [vmem:[%s3817_s2 + $0x198] sm:$0xff] }
  0x11   :  { %144 = vmatpush1.msra.mxu0 %v34_v31  ;;  %257 = vmatpush1.msra.mxu1 %v36_v32  ;;  %v2464_v49 = vld [vmem:[%s3817_s2 + $0x180] sm:$0xff]  ;;  %v2469_v50 = vld [vmem:[%s3817_s2 + $0x190] sm:$0xff]  ;;  %v2481_v52 = vld [vmem:[%s3817_s2 + $0x168] sm:$0xff] }
  0x12   :  { %1935 = vmatmul.mubr.msk.f32.vlgmr.msra.gmra.mxu0 %vm88_vm0, %v26_v33  ;;  %1943 = vmatmul.mubr.msk.f32.vlgmr.msra.gmra.mxu1 %vm88_vm0, %v26_v33  ;;  %v28_v51 = vld [vmem:[%s3816_s0 + $0x10] sm:$0xff]  ;;  %v2486_v53 = vld [vmem:[%s3817_s2 + $0x178] sm:$0xff]  ;;  %v2493_v54 = vld [vmem:[%s3817_s2 + $0x160] sm:$0xff] }
  0x13   :  { %439 = vmatprep.subr.mxu0 %v2373_v34  ;;  %510 = vmatprep.subr.mxu1 %v2378_v35  ;;  %v2498_v55 = vld [vmem:[%s3817_s2 + $0x170] sm:$0xff]  ;;  %v2505_v56 = vld [vmem:[%s3817_s2 + $0x148] sm:$0xff]  ;;  %v2510_v57 = vld [vmem:[%s3817_s2 + $0x158] sm:$0xff] }
  0x14   :  { %440 = vmatpush1.msra.mxu0 %v2383_v36  ;;  %511 = vmatpush1.msra.mxu1 %v2388_v37  ;;  %v2519_v58 = vld [vmem:[%s3817_s2 + $0x140] sm:$0xff]  ;;  %v2524_v59 = vld [vmem:[%s3817_s2 + $0x150] sm:$0xff]  ;;  %v29_v60 = vld [vmem:[%s3816_s0 + $0x18] sm:$0xff] }
  0x15   :  { %441 = vmatprep.subr.mxu0 %v2395_v38  ;;  %512 = vmatprep.subr.mxu1 %v2400_v39  ;;  %v2536_v61 = vld [vmem:[%s3817_s2 + $0x128] sm:$0xff]  ;;  %v2541_v62 = vld [vmem:[%s3817_s2 + $0x138] sm:$0xff]  ;;  %v2548_v63 = vld [vmem:[%s3817_s2 + $0x120] sm:$0xff] }
  0x16   :  { %183 = vmatprep.mubr.f32.mxu0 %v3824_v3  ;;  %296 = vmatprep.mubr.f32.mxu1 %v3824_v3  ;;  %v2553_v0 = vld [vmem:[%s3817_s2 + $0x130] sm:$0xff]  ;;  %v2560_v1 = vld [vmem:[%s3817_s2 + $0x108] sm:$0xff]  ;;  %v2565_v2 = vld [vmem:[%s3817_s2 + $0x118] sm:$0xff] }
  0x17   :  { %442 = vmatpush1.msra.mxu0 %v2409_v40  ;;  %513 = vmatpush1.msra.mxu1 %v2414_v41  ;;  %v2574_v4 = vld [vmem:[%s3817_s2 + $0x100] sm:$0xff]  ;;  %v2579_v5 = vld [vmem:[%s3817_s2 + $0x110] sm:$0xff]  ;;  %v2591_v7 = vld [vmem:[%s3817_s2 + $0xe8] sm:$0xff] }
  0x18   :  { %1936 = vmatmul.mubr.msk.f32.gmra.mxu0 %vm88_vm0, %v27_v42  ;;  %1944 = vmatmul.mubr.msk.f32.gmra.mxu1 %vm88_vm0, %v27_v42  ;;  %v30_v6 = vld [vmem:[%s3816_s0 + $0x20] sm:$0xff]  ;;  %v2596_v8 = vld [vmem:[%s3817_s2 + $0xf8] sm:$0xff]  ;;  %v2608_v10 = vld [vmem:[%s3817_s2 + $0xf0] sm:$0xff] }
  0x19   :  { %443 = vmatprep.subr.mxu0 %v2426_v43  ;;  %514 = vmatprep.subr.mxu1 %v2431_v44  ;;  %v2603_v9 = vld [vmem:[%s3817_s2 + $0xe0] sm:$0xff]  ;;  %v2615_v11 = vld [vmem:[%s3817_s2 + $0xc8] sm:$0xff]  ;;  %v2620_v12 = vld [vmem:[%s3817_s2 + $0xd8] sm:$0xff] }
  0x1a   :  { %444 = vmatpush1.msra.mxu0 %v2438_v45  ;;  %515 = vmatpush1.msra.mxu1 %v2443_v46  ;;  %v2629_v13 = vld [vmem:[%s3817_s2 + $0xc0] sm:$0xff]  ;;  %v2634_v14 = vld [vmem:[%s3817_s2 + $0xd0] sm:$0xff]  ;;  %v31_v15 = vld [vmem:[%s3816_s0 + $0x28] sm:$0xff] }
  0x1b   :  { %445 = vmatprep.subr.mxu0 %v2450_v47  ;;  %516 = vmatprep.subr.mxu1 %v2455_v48  ;;  %v2646_v16 = vld [vmem:[%s3817_s2 + $0xa8] sm:$0xff]  ;;  %v2651_v17 = vld [vmem:[%s3817_s2 + $0xb8] sm:$0xff]  ;;  %v2658_v18 = vld [vmem:[%s3817_s2 + $0xa0] sm:$0xff] }
  0x1c   :  { %189 = vmatprep.mubr.f32.mxu0 %v3824_v3  ;;  %302 = vmatprep.mubr.f32.mxu1 %v3824_v3  ;;  %v2663_v19 = vld [vmem:[%s3817_s2 + $0xb0] sm:$0xff]  ;;  %v2670_v20 = vld [vmem:[%s3817_s2 + $0x88] sm:$0xff]  ;;  %v2675_v21 = vld [vmem:[%s3817_s2 + $0x98] sm:$0xff] }
  0x1d   :  { %446 = vmatpush1.msra.mxu0 %v2464_v49  ;;  %517 = vmatpush1.msra.mxu1 %v2469_v50  ;;  %3914 = vst [vmem:[#allocation5_spill] sm:$0xff] %v2670_v20  ;;  %3915 = vst [vmem:[#allocation6_spill] sm:$0xff] %v2675_v21  ;;  %v2684_v22 = vld [vmem:[%s3817_s2 + $0x80] sm:$0xff]  ;;  %v2689_v23 = vld [vmem:[%s3817_s2 + $0x90] sm:$0xff] }
  0x1e   :  { %1937 = vmatmul.mubr.msk.f32.gmra.mxu0 %vm88_vm0, %v28_v51  ;;  %1945 = vmatmul.mubr.msk.f32.gmra.mxu1 %vm88_vm0, %v28_v51  ;;  %3916 = vst [vmem:[#allocation7_spill] sm:$0xff] %v2684_v22  ;;  %3917 = vst [vmem:[#allocation8_spill] sm:$0xff] %v2689_v23  ;;  %v32_v24 = vld [vmem:[%s3816_s0 + $0x30] sm:$0xff]  ;;  %v2701_v25 = vld [vmem:[%s3817_s2 + $0x68] sm:$0xff] }
  0x1f   :  { %447 = vmatprep.subr.mxu0 %v2481_v52  ;;  %518 = vmatprep.subr.mxu1 %v2486_v53  ;;  %3918 = vst [vmem:[#allocation9_spill] sm:$0xff] %v2701_v25  ;;  %v2706_v26 = vld [vmem:[%s3817_s2 + $0x78] sm:$0xff]  ;;  %v2713_v27 = vld [vmem:[%s3817_s2 + $0x60] sm:$0xff]  ;;  %v2718_v28 = vld [vmem:[%s3817_s2 + $0x70] sm:$0xff] }
  0x20   :  { %448 = vmatpush1.msra.mxu0 %v2493_v54  ;;  %519 = vmatpush1.msra.mxu1 %v2498_v55  ;;  %3919 = vst [vmem:[#allocation10_spill] sm:$0xff] %v2706_v26  ;;  %3920 = vst [vmem:[#allocation11_spill] sm:$0xff] %v2713_v27  ;;  %v2725_v29 = vld [vmem:[%s3817_s2 + $0x48] sm:$0xff]  ;;  %v2730_v30 = vld [vmem:[%s3817_s2 + $0x58] sm:$0xff] }
  0x21   :  { %449 = vmatprep.subr.mxu0 %v2505_v56  ;;  %520 = vmatprep.subr.mxu1 %v2510_v57  ;;  %3921 = vst [vmem:[#allocation12_spill] sm:$0xff] %v2718_v28  ;;  %3922 = vst [vmem:[#allocation13_spill] sm:$0xff] %v2725_v29  ;;  %v2739_v31 = vld [vmem:[%s3817_s2 + $0x40] sm:$0xff]  ;;  %v2744_v32 = vld [vmem:[%s3817_s2 + $0x50] sm:$0xff] }
  0x22   :  { %195 = vmatprep.mubr.f32.mxu0 %v3824_v3  ;;  %308 = vmatprep.mubr.f32.mxu1 %v3824_v3  ;;  %3923 = vst [vmem:[#allocation14_spill] sm:$0xff] %v2730_v30  ;;  %3924 = vst [vmem:[#allocation15_spill] sm:$0xff] %v2739_v31  ;;  %v33_v33 = vld [vmem:[%s3816_s0 + $0x38] sm:$0xff]  ;;  %v2756_v42 = vld [vmem:[%s3817_s2 + $0x28] sm:$0xff] }
  0x23   :  { %450 = vmatpush1.msra.mxu0 %v2519_v58  ;;  %521 = vmatpush1.msra.mxu1 %v2524_v59  ;;  %3925 = vst [vmem:[#allocation16_spill] sm:$0xff] %v2744_v32  ;;  %3926 = vst [vmem:[#allocation17_spill] sm:$0xff] %v2756_v42  ;;  %v2761_v51 = vld [vmem:[%s3817_s2 + $0x38] sm:$0xff] }
  0x24   :  { %1938 = vmatmul.mubr.msk.f32.gmra.mxu0 %vm88_vm0, %v29_v60  ;;  %1946 = vmatmul.mubr.msk.f32.gmra.mxu1 %vm88_vm0, %v29_v60  ;;  %3927 = vst [vmem:[#allocation18_spill] sm:$0xff] %v2761_v51  ;;  %v2768_v60 = vld [vmem:[%s3817_s2 + $0x20] sm:$0xff] }
  0x25   :  { %451 = vmatprep.subr.mxu0 %v2536_v61  ;;  %522 = vmatprep.subr.mxu1 %v2541_v62  ;;  %3928 = vst [vmem:[#allocation19_spill] sm:$0xff] %v2768_v60 }
  0x26   :  { %452 = vmatpush1.msra.mxu0 %v2548_v63  ;;  %523 = vmatpush1.msra.mxu1 %v2553_v0 }
  0x27   :  { %453 = vmatprep.subr.mxu0 %v2560_v1  ;;  %524 = vmatprep.subr.mxu1 %v2565_v2 }
  0x28   :  { %201 = vmatprep.mubr.f32.mxu0 %v3824_v3  ;;  %314 = vmatprep.mubr.f32.mxu1 %v3824_v3 }
  0x29   :  { %454 = vmatpush1.msra.mxu0 %v2574_v4  ;;  %525 = vmatpush1.msra.mxu1 %v2579_v5 }
  0x2a   :  { %1939 = vmatmul.mubr.msk.f32.gmra.mxu0 %vm88_vm0, %v30_v6  ;;  %1947 = vmatmul.mubr.msk.f32.gmra.mxu1 %vm88_vm0, %v30_v6  ;;  %v2773_v6 = vld [vmem:[%s3817_s2 + $0x30] sm:$0xff] }
  0x2b   :  { %455 = vmatprep.subr.mxu0 %v2591_v7  ;;  %526 = vmatprep.subr.mxu1 %v2596_v8  ;;  %3929 = vst [vmem:[#allocation20_spill] sm:$0xff] %v2773_v6 }
  0x2c   :  { %456 = vmatpush1.msra.mxu0 %v2603_v9  ;;  %527 = vmatpush1.msra.mxu1 %v2608_v10 }
  0x2d   :  { %457 = vmatprep.subr.mxu0 %v2615_v11  ;;  %528 = vmatprep.subr.mxu1 %v2620_v12 }
  0x2e   :  { %207 = vmatprep.mubr.f32.mxu0 %v3824_v3  ;;  %320 = vmatprep.mubr.f32.mxu1 %v3824_v3 }
  0x2f   :  { %458 = vmatpush1.msra.mxu0 %v2629_v13  ;;  %529 = vmatpush1.msra.mxu1 %v2634_v14 }
  0x30   :  { %1940 = vmatmul.mubr.msk.f32.gmra.mxu0 %vm88_vm0, %v31_v15  ;;  %1948 = vmatmul.mubr.msk.f32.gmra.mxu1 %vm88_vm0, %v31_v15  ;;  %v2780_v15 = vld [vmem:[%s3817_s2 + $0x8] sm:$0xff] }
  0x31   :  { %459 = vmatprep.subr.mxu0 %v2646_v16  ;;  %530 = vmatprep.subr.mxu1 %v2651_v17  ;;  %3930 = vst [vmem:[#allocation21_spill] sm:$0xff] %v2780_v15 }
  0x32   :  { %460 = vmatpush1.msra.mxu0 %v2658_v18  ;;  %531 = vmatpush1.msra.mxu1 %v2663_v19 }
  0x33   :  { %461 = vmatprep.subr.mxu0 %v2670_v20  ;;  %532 = vmatprep.subr.mxu1 %v2675_v21 }
  0x34   :  { %213 = vmatprep.mubr.f32.mxu0 %v3824_v3  ;;  %326 = vmatprep.mubr.f32.mxu1 %v3824_v3 }
  0x35   :  { %462 = vmatpush1.msra.mxu0 %v2684_v22  ;;  %533 = vmatpush1.msra.mxu1 %v2689_v23 }
  0x36   :  { %1941 = vmatmul.mubr.msk.f32.gmra.mxu0 %vm88_vm0, %v32_v24  ;;  %1949 = vmatmul.mubr.msk.f32.gmra.mxu1 %vm88_vm0, %v32_v24  ;;  %v2785_v24 = vld [vmem:[%s3817_s2 + $0x18] sm:$0xff] }
  0x37   :  { %463 = vmatprep.subr.mxu0 %v2701_v25  ;;  %534 = vmatprep.subr.mxu1 %v2706_v26  ;;  %3931 = vst [vmem:[#allocation22_spill] sm:$0xff] %v2785_v24 }
  0x38   :  { %464 = vmatpush1.msra.mxu0 %v2713_v27  ;;  %535 = vmatpush1.msra.mxu1 %v2718_v28 }
  0x39   :  { %465 = vmatprep.subr.mxu0 %v2725_v29  ;;  %536 = vmatprep.subr.mxu1 %v2730_v30 }
  0x3a   :  { %219 = vmatprep.mubr.f32.mxu0 %v3824_v3  ;;  %332 = vmatprep.mubr.f32.mxu1 %v3824_v3  ;;  %v2792_v3 = vld [vmem:[%s3817_s2] sm:$0xff] }
  0x3b   :  { %466 = vmatpush1.msra.mxu0 %v2739_v31  ;;  %537 = vmatpush1.msra.mxu1 %v2744_v32  ;;  %3932 = vst [vmem:[#allocation23_spill] sm:$0xff] %v2792_v3 }
  0x3c   :  { %1942 = vmatmul.mubr.msk.f32.gmra.mxu0 %vm88_vm0, %v33_v33  ;;  %1950 = vmatmul.mubr.msk.f32.gmra.mxu1 %vm88_vm0, %v33_v33  ;;  %v2799_v33 = vld [vmem:[%s3817_s2 + $0x10] sm:$0xff] }
  0x3d   :  { %467 = vmatprep.subr.mxu0 %v2756_v42  ;;  %538 = vmatprep.subr.mxu1 %v2761_v51  ;;  %3933 = vst [vmem:[#allocation24_spill] sm:$0xff] %v2799_v33  ;;  %v3934_v51 = vmov 0.0  }
  0x3e   :  { %468 = vmatpush1.msra.mxu0 %v2768_v60  ;;  %539 = vmatpush1.msra.mxu1 %v2773_v6 }
  0x3f   :  { %469 = vmatprep.subr.mxu0 %v2780_v15  ;;  %540 = vmatprep.subr.mxu1 %v2785_v24 }
  0x40   :  { %470 = vmatpush1.msra.mxu0 %v2792_v3  ;;  %503 = vmatprep.mubr.f32.mxu0 %v3934_v51 }
  0x41   :  { %541 = vmatpush1.msra.mxu1 %v2799_v33  ;;  %574 = vmatprep.mubr.f32.mxu1 %v3934_v51 }
  0x42   :  { %504 = vmatmul.mubr.f32.vlgmr.msra.gmra.mxu0 %v3934_v51  ;;  %575 = vmatmul.mubr.f32.vlgmr.msra.gmra.mxu1 %v3934_v51 }
  0x43   :  { %613 = vmatprep.subr.mxu0 %v2373_v34  ;;  %684 = vmatprep.subr.mxu1 %v2378_v35 }
  0x44   :  { %614 = vmatpush1.msra.mxu0 %v2383_v36  ;;  %685 = vmatpush1.msra.mxu1 %v2388_v37 }
  0x45   :  { %615 = vmatprep.subr.mxu0 %v2395_v38  ;;  %686 = vmatprep.subr.mxu1 %v2400_v39 }
  0x46   :  { %616 = vmatpush1.msra.mxu0 %v2409_v40  ;;  %687 = vmatpush1.msra.mxu1 %v2414_v41 }
  0x47   :  { %617 = vmatprep.subr.mxu0 %v2426_v43  ;;  %688 = vmatprep.subr.mxu1 %v2431_v44 }
  0x48   :  { %618 = vmatpush1.msra.mxu0 %v2438_v45  ;;  %689 = vmatpush1.msra.mxu1 %v2443_v46 }
  0x49   :  { %619 = vmatprep.subr.mxu0 %v2450_v47  ;;  %690 = vmatprep.subr.mxu1 %v2455_v48 }
  0x4a   :  { %620 = vmatpush1.msra.mxu0 %v2464_v49  ;;  %691 = vmatpush1.msra.mxu1 %v2469_v50 }
  0x4b   :  { %621 = vmatprep.subr.mxu0 %v2481_v52  ;;  %692 = vmatprep.subr.mxu1 %v2486_v53 }
  0x4c   :  { %622 = vmatpush1.msra.mxu0 %v2493_v54  ;;  %693 = vmatpush1.msra.mxu1 %v2498_v55 }
  0x4d   :  { %623 = vmatprep.subr.mxu0 %v2505_v56  ;;  %694 = vmatprep.subr.mxu1 %v2510_v57 }
  0x4e   :  { %624 = vmatpush1.msra.mxu0 %v2519_v58  ;;  %695 = vmatpush1.msra.mxu1 %v2524_v59 }
  0x4f   :  { %625 = vmatprep.subr.mxu0 %v2536_v61  ;;  %696 = vmatprep.subr.mxu1 %v2541_v62 }
  0x50   :  { %626 = vmatpush1.msra.mxu0 %v2548_v63  ;;  %697 = vmatpush1.msra.mxu1 %v2553_v0 }
  0x51   :  { %627 = vmatprep.subr.mxu0 %v2560_v1  ;;  %698 = vmatprep.subr.mxu1 %v2565_v2 }
  0x52   :  { %628 = vmatpush1.msra.mxu0 %v2574_v4  ;;  %699 = vmatpush1.msra.mxu1 %v2579_v5 }
  0x53   :  { %629 = vmatprep.subr.mxu0 %v2591_v7  ;;  %700 = vmatprep.subr.mxu1 %v2596_v8 }
  0x54   :  { %630 = vmatpush1.msra.mxu0 %v2603_v9  ;;  %701 = vmatpush1.msra.mxu1 %v2608_v10 }
  0x55   :  { %631 = vmatprep.subr.mxu0 %v2615_v11  ;;  %702 = vmatprep.subr.mxu1 %v2620_v12 }
  0x56   :  { %632 = vmatpush1.msra.mxu0 %v2629_v13  ;;  %703 = vmatpush1.msra.mxu1 %v2634_v14 }
  0x57   :  { %633 = vmatprep.subr.mxu0 %v2646_v16  ;;  %704 = vmatprep.subr.mxu1 %v2651_v17 }
  0x58   :  { %634 = vmatpush1.msra.mxu0 %v2658_v18  ;;  %705 = vmatpush1.msra.mxu1 %v2663_v19 }
  0x59   :  { %635 = vmatprep.subr.mxu0 %v2670_v20  ;;  %706 = vmatprep.subr.mxu1 %v2675_v21 }
  0x5a   :  { %636 = vmatpush1.msra.mxu0 %v2684_v22  ;;  %707 = vmatpush1.msra.mxu1 %v2689_v23  ;;  %v3935_v22 = vld [vmem:[#allocation18_spill] sm:$0xff] }
  0x5b   :  { %637 = vmatprep.subr.mxu0 %v2701_v25  ;;  %708 = vmatprep.subr.mxu1 %v2706_v26 }
  0x5c   :  { %638 = vmatpush1.msra.mxu0 %v2713_v27  ;;  %709 = vmatpush1.msra.mxu1 %v2718_v28 }
  0x5d   :  { %639 = vmatprep.subr.mxu0 %v2725_v29  ;;  %710 = vmatprep.subr.mxu1 %v2730_v30 }
  0x5e   :  { %640 = vmatpush1.msra.mxu0 %v2739_v31  ;;  %711 = vmatpush1.msra.mxu1 %v2744_v32 }
  0x5f   :  { %641 = vmatprep.subr.mxu0 %v2756_v42  ;;  %712 = vmatprep.subr.mxu1 %v3935_v22  ;;  %v68_v22 = vlaneseq }
  0x60   :  { %642 = vmatpush1.msra.mxu0 %v2768_v60  ;;  %713 = vmatpush1.msra.mxu1 %v2773_v6 }
  0x61   :  { %643 = vmatprep.subr.mxu0 %v2780_v15  ;;  %714 = vmatprep.subr.mxu1 %v2785_v24  ;;  %v69_v60 = vshrl.u32 %v68_v22, 7 }
  0x62   :  { %644 = vmatpush1.msra.mxu0 %v2792_v3  ;;  %677 = vmatprep.mubr.f32.mxu0 %v3934_v51  ;;  %v66_v3 = vld [vmem:[%s3818_s3] sm:$0xf] }
  0x63   :  { %715 = vmatpush1.msra.mxu1 %v2799_v33  ;;  %748 = vmatprep.mubr.f32.mxu1 %v3934_v51  ;;  %v70_v15 = vsub.s32 0, %v69_v60  ;;  %v78_v24 = vsub.s32 2, %v69_v60  ;;  %v74_v51 = vsub.s32 1, %v69_v60 }
  0x64   :  { %787 = vmatprep.subr.mxu0 %v2373_v34  ;;  %858 = vmatprep.subr.mxu1 %v2378_v35  ;;  %v82_v34 = vsub.s32 3, %v69_v60 }
  0x65   :  { %v71_v31 = vrot.slane %v66_v3, %v70_v15  ;;  %v2888_v35 = vrot.slane %v66_v3, %v78_v24  ;;  %v75_v29 = vrot.slane %v66_v3, %v74_v51 }
  0x66   :  { %v2890_v28 = vrot.slane %v66_v3, %v82_v34 }
  0xd2   :  { %v2877_v42 = vpop.f32.mrf.mxu0  ;;  %v2879_v6 = vpop.f32.mrf.mxu1 }
  0xd4   :  { %v2884_v32 = vpop.f32.mrf.mxu0  ;;  %v2886_v33 = vpop.f32.mrf.mxu1 }
  0xd8   :  { %v185_v22 = vpop.f32.mrf.mxu0  ;;  %v298_v30 = vpop.f32.mrf.mxu1 }
  0xd9   :  { %v2892_v27 = vadd.f32 %v185_v22, %v71_v31  ;;  %v2895_v26 = vadd.f32 %v298_v30, %v2888_v35 }
  0xda   :  { %v187_v25 = vpop.f32.mrf.mxu0  ;;  %v300_v23 = vpop.f32.mrf.mxu1 }
  0xdb   :  { %3936 = vst [vmem:[#allocation25_spill] sm:$0xff] %v2892_v27  ;;  %3937 = vst [vmem:[#allocation26_spill] sm:$0xff] %v2895_v26  ;;  %v2897_v21 = vadd.f32 %v187_v25, %v75_v29  ;;  %v2900_v20 = vadd.f32 %v300_v23, %v2890_v28 }
  0xdd   :  { %3938 = vst [vmem:[#allocation27_spill] sm:$0xff] %v2897_v21  ;;  %3939 = vst [vmem:[#allocation28_spill] sm:$0xff] %v2900_v20 }
  0xde   :  { %v191_v60 = vpop.f32.mrf.mxu0  ;;  %v304_v15 = vpop.f32.mrf.mxu1 }
  0xdf   :  { %v2902_v24 = vadd.f32 %v191_v60, %v71_v31  ;;  %v2905_v51 = vadd.f32 %v304_v15, %v2888_v35 }
  0xe0   :  { %v193_v3 = vpop.f32.mrf.mxu0  ;;  %v306_v34 = vpop.f32.mrf.mxu1 }
  0xe1   :  { %3940 = vst [vmem:[#allocation29_spill] sm:$0xff] %v2902_v24  ;;  %3941 = vst [vmem:[#allocation30_spill] sm:$0xff] %v2905_v51  ;;  %v2907_v22 = vadd.f32 %v193_v3, %v75_v29  ;;  %v2910_v30 = vadd.f32 %v306_v34, %v2890_v28 }
  0xe3   :  { %3942 = vst [vmem:[#allocation31_spill] sm:$0xff] %v2907_v22  ;;  %3943 = vst [vmem:[#allocation32_spill] sm:$0xff] %v2910_v30 }
  0xe4   :  { %v197_v26 = vpop.f32.mrf.mxu0  ;;  %v310_v25 = vpop.f32.mrf.mxu1 }
  0xe5   :  { %v2912_v21 = vadd.f32 %v197_v26, %v71_v31  ;;  %v2915_v23 = vadd.f32 %v310_v25, %v2888_v35 }
  0xe6   :  { %v199_v20 = vpop.f32.mrf.mxu0  ;;  %v312_v60 = vpop.f32.mrf.mxu1 }
  0xe7   :  { %3944 = vst [vmem:[#allocation33_spill] sm:$0xff] %v2912_v21  ;;  %3945 = vst [vmem:[#allocation34_spill] sm:$0xff] %v2915_v23  ;;  %v2917_v24 = vadd.f32 %v199_v20, %v75_v29  ;;  %v2920_v15 = vadd.f32 %v312_v60, %v2890_v28 }
  0xe9   :  { %3946 = vst [vmem:[#allocation35_spill] sm:$0xff] %v2917_v24  ;;  %3947 = vst [vmem:[#allocation36_spill] sm:$0xff] %v2920_v15 }
  0xea   :  { %v203_v51 = vpop.f32.mrf.mxu0  ;;  %v316_v3 = vpop.f32.mrf.mxu1 }
  0xeb   :  { %v2922_v22 = vadd.f32 %v203_v51, %v71_v31  ;;  %v2925_v34 = vadd.f32 %v316_v3, %v2888_v35 }
  0xec   :  { %v205_v30 = vpop.f32.mrf.mxu0  ;;  %v318_v26 = vpop.f32.mrf.mxu1 }
  0xed   :  { %3948 = vst [vmem:[#allocation37_spill] sm:$0xff] %v2922_v22  ;;  %3949 = vst [vmem:[#allocation38_spill] sm:$0xff] %v2925_v34  ;;  %v2927_v21 = vadd.f32 %v205_v30, %v75_v29  ;;  %v2930_v25 = vadd.f32 %v318_v26, %v2890_v28 }
  0xef   :  { %3950 = vst [vmem:[#allocation39_spill] sm:$0xff] %v2927_v21  ;;  %3951 = vst [vmem:[#allocation40_spill] sm:$0xff] %v2930_v25 }
  0xf0   :  { %v209_v23 = vpop.f32.mrf.mxu0  ;;  %v322_v20 = vpop.f32.mrf.mxu1 }
  0xf1   :  { %v2932_v24 = vadd.f32 %v209_v23, %v71_v31  ;;  %v2935_v60 = vadd.f32 %v322_v20, %v2888_v35 }
  0xf2   :  { %v211_v15 = vpop.f32.mrf.mxu0  ;;  %v324_v51 = vpop.f32.mrf.mxu1 }
  0xf3   :  { %3952 = vst [vmem:[#allocation41_spill] sm:$0xff] %v2932_v24  ;;  %3953 = vst [vmem:[#allocation42_spill] sm:$0xff] %v2935_v60  ;;  %v2937_v22 = vadd.f32 %v211_v15, %v75_v29  ;;  %v2940_v3 = vadd.f32 %v324_v51, %v2890_v28 }
  0xf5   :  { %3954 = vst [vmem:[#allocation43_spill] sm:$0xff] %v2937_v22  ;;  %3955 = vst [vmem:[#allocation44_spill] sm:$0xff] %v2940_v3 }
  0xf6   :  { %v215_v34 = vpop.f32.mrf.mxu0  ;;  %v328_v30 = vpop.f32.mrf.mxu1 }
  0xf7   :  { %v2942_v21 = vadd.f32 %v215_v34, %v71_v31  ;;  %v2945_v26 = vadd.f32 %v328_v30, %v2888_v35 }
  0xf8   :  { %v217_v25 = vpop.f32.mrf.mxu0  ;;  %v330_v23 = vpop.f32.mrf.mxu1 }
  0xf9   :  { %3956 = vst [vmem:[#allocation45_spill] sm:$0xff] %v2942_v21  ;;  %3957 = vst [vmem:[#allocation46_spill] sm:$0xff] %v2945_v26  ;;  %v2947_v24 = vadd.f32 %v217_v25, %v75_v29  ;;  %v2950_v20 = vadd.f32 %v330_v23, %v2890_v28  ;;  %v180_v25 = vadd.f32 %v2877_v42, %v71_v31 }
  0xfa   :  { %v182_v23 = vadd.f32 %v2884_v32, %v75_v29 }
  0xfb   :  { %3958 = vst [vmem:[#allocation47_spill] sm:$0xff] %v2947_v24  ;;  %3959 = vst [vmem:[#allocation48_spill] sm:$0xff] %v2950_v20 }
  0xfc   :  { %v221_v60 = vpop.f32.mrf.mxu0  ;;  %v334_v15 = vpop.f32.mrf.mxu1 }
  0xfd   :  { %v2952_v22 = vadd.f32 %v221_v60, %v71_v31  ;;  %v2955_v51 = vadd.f32 %v334_v15, %v2888_v35 }
  0xfe   :  { %v223_v3 = vpop.f32.mrf.mxu0  ;;  %v336_v34 = vpop.f32.mrf.mxu1 }
  0xff   :  { %3960 = vst [vmem:[#allocation49_spill] sm:$0xff] %v2952_v22  ;;  %3961 = vst [vmem:[#allocation50_spill] sm:$0xff] %v2955_v51  ;;  %v2957_v21 = vadd.f32 %v223_v3, %v75_v29  ;;  %v2960_v30 = vadd.f32 %v336_v34, %v2890_v28  ;;  %v295_v3 = vadd.f32 %v2886_v33, %v2890_v28 }
 0x100   :  { %v293_v34 = vadd.f32 %v2879_v6, %v2888_v35 }
 0x101   :  { %3962 = vst [vmem:[#allocation51_spill] sm:$0xff] %v2957_v21  ;;  %3963 = vst [vmem:[#allocation52_spill] sm:$0xff] %v2960_v30 }
 0x102   :  { %v505_v26 = vpop.f32.mrf.mxu0  ;;  %v576_v22 = vpop.f32.mrf.mxu1 }
 0x103   :  { %v581_v20 = vadd.f32 %v505_v26, %v180_v25  ;;  %v583_v30 = vadd.f32 %v576_v22, %v293_v34  ;;  %v3964_v22 = vld [vmem:[#allocation5_spill] sm:$0xff]  ;;  %v3969_v34 = vld [vmem:[#allocation10_spill] sm:$0xff] }
 0x104   :  { %v507_v24 = vpop.f32.mrf.mxu0  ;;  %v578_v51 = vpop.f32.mrf.mxu1 }
 0x105   :  { %v1951_v27 = vmul.f32 -1.442695, %v581_v20  ;;  %v582_v60 = vadd.f32 %v507_v24, %v182_v23  ;;  %v584_v21 = vadd.f32 %v578_v51, %v295_v3  ;;  %v3968_v3 = vld [vmem:[#allocation9_spill] sm:$0xff] }
 0x107   :  { %2030 = vpow2.f32 %v1951_v27  ;;  %v1952_v15 = vmul.f32 -1.442695, %v582_v60  ;;  %v1953_v31 = vmul.f32 -1.442695, %v584_v21  ;;  %v3966_v60 = vld [vmem:[#allocation7_spill] sm:$0xff] }
 0x109   :  { %2032 = vpow2.f32 %v1952_v15  ;;  %v3967_v15 = vld [vmem:[#allocation8_spill] sm:$0xff] }
 0x10a   :  { %2034 = vpow2.f32 %v1953_v31  ;;  %v3970_v31 = vld [vmem:[#allocation11_spill] sm:$0xff] }
 0x114   :  { %v2031_v42 = vpop.eup %2030 }
 0x115   :  { %v588_v29 = vadd.f32 1.0, %v2031_v42  ;;  %v3971_v42 = vld [vmem:[#allocation12_spill] sm:$0xff] }
 0x116   :  { %v2033_v32 = vpop.eup %2032 }
 0x117   :  { %2036 = vrcp.f32 %v588_v29  ;;  %v594_v24 = vadd.f32 1.0, %v2033_v32  ;;  %v2035_v27 = vpop.eup %2034  ;;  %v3972_v29 = vld [vmem:[#allocation13_spill] sm:$0xff]  ;;  %v3973_v32 = vld [vmem:[#allocation14_spill] sm:$0xff] }
 0x118   :  { %2038 = vtanh.f32 %v583_v30  ;;  %v601_v23 = vadd.f32 1.0, %v2035_v27  ;;  %v3965_v30 = vld [vmem:[#allocation6_spill] sm:$0xff]  ;;  %v3975_v27 = vld [vmem:[#allocation16_spill] sm:$0xff] }
 0x119   :  { %2040 = vrcp.f32 %v594_v24  ;;  %v3974_v24 = vld [vmem:[#allocation15_spill] sm:$0xff] }
 0x11a   :  { %2042 = vrcp.f32 %v601_v23  ;;  %v3979_v23 = vld [vmem:[#allocation20_spill] sm:$0xff] }
 0x124   :  { %v2037_v26 = vpop.eup %2036 }
 0x125   :  { %v2039_v20 = vpop.eup %2038 }
 0x126   :  { %v2041_v25 = vpop.eup %2040  ;;  %v605_v33 = vmul.f32 %v2039_v20, %v2037_v26  ;;  %v3976_v26 = vld [vmem:[#allocation17_spill] sm:$0xff]  ;;  %v3977_v20 = vld [vmem:[#allocation18_spill] sm:$0xff] }
 0x127   :  { %v604_v28 = vmul.f32 0.0, %v2041_v25  ;;  %v2043_v35 = vpop.eup %2042  ;;  %v3978_v25 = vld [vmem:[#allocation19_spill] sm:$0xff] }
 0x129   :  { %v2968_v51 = vadd.f32 %v605_v33, %v604_v28  ;;  %v3980_v28 = vld [vmem:[#allocation21_spill] sm:$0xff]  ;;  %v3981_v33 = vld [vmem:[#allocation22_spill] sm:$0xff] }
 0x12b   :  { %2044 = vtanh.f32 %v2968_v51 }
 0x138   :  { %v2045_v21 = vpop.eup %2044 }
 0x139   :  { %v608_v6 = vmul.f32 %v2045_v21, %v2043_v35  ;;  %v3982_v35 = vld [vmem:[#allocation23_spill] sm:$0xff]  ;;  %v3983_v21 = vmov 0.0  }
 0x13b   :  { %678 = vmatmul.mubr.f32.vlgmr.msra.gmra.mxu0 %v608_v6  ;;  %749 = vmatmul.mubr.f32.vlgmr.msra.gmra.mxu1 %v608_v6  ;;  %v3984_v6 = vld [vmem:[#allocation24_spill] sm:$0xff] }
 0x13c   :  { %788 = vmatpush1.msra.mxu0 %v2383_v36  ;;  %859 = vmatpush1.msra.mxu1 %v2388_v37 }
 0x13d   :  { %789 = vmatprep.subr.mxu0 %v2395_v38  ;;  %860 = vmatprep.subr.mxu1 %v2400_v39 }
 0x13e   :  { %790 = vmatpush1.msra.mxu0 %v2409_v40  ;;  %861 = vmatpush1.msra.mxu1 %v2414_v41 }
 0x13f   :  { %791 = vmatprep.subr.mxu0 %v2426_v43  ;;  %862 = vmatprep.subr.mxu1 %v2431_v44 }
 0x140   :  { %792 = vmatpush1.msra.mxu0 %v2438_v45  ;;  %863 = vmatpush1.msra.mxu1 %v2443_v46 }
 0x141   :  { %793 = vmatprep.subr.mxu0 %v2450_v47  ;;  %864 = vmatprep.subr.mxu1 %v2455_v48 }
 0x142   :  { %794 = vmatpush1.msra.mxu0 %v2464_v49  ;;  %865 = vmatpush1.msra.mxu1 %v2469_v50 }
 0x143   :  { %795 = vmatprep.subr.mxu0 %v2481_v52  ;;  %866 = vmatprep.subr.mxu1 %v2486_v53 }
 0x144   :  { %796 = vmatpush1.msra.mxu0 %v2493_v54  ;;  %867 = vmatpush1.msra.mxu1 %v2498_v55 }
 0x145   :  { %797 = vmatprep.subr.mxu0 %v2505_v56  ;;  %868 = vmatprep.subr.mxu1 %v2510_v57 }
 0x146   :  { %798 = vmatpush1.msra.mxu0 %v2519_v58  ;;  %869 = vmatpush1.msra.mxu1 %v2524_v59 }
 0x147   :  { %799 = vmatprep.subr.mxu0 %v2536_v61  ;;  %870 = vmatprep.subr.mxu1 %v2541_v62 }
 0x148   :  { %800 = vmatpush1.msra.mxu0 %v2548_v63  ;;  %871 = vmatpush1.msra.mxu1 %v2553_v0 }
 0x149   :  { %801 = vmatprep.subr.mxu0 %v2560_v1  ;;  %872 = vmatprep.subr.mxu1 %v2565_v2 }
 0x14a   :  { %802 = vmatpush1.msra.mxu0 %v2574_v4  ;;  %873 = vmatpush1.msra.mxu1 %v2579_v5 }
 0x14b   :  { %803 = vmatprep.subr.mxu0 %v2591_v7  ;;  %874 = vmatprep.subr.mxu1 %v2596_v8 }
 0x14c   :  { %804 = vmatpush1.msra.mxu0 %v2603_v9  ;;  %875 = vmatpush1.msra.mxu1 %v2608_v10 }
 0x14d   :  { %805 = vmatprep.subr.mxu0 %v2615_v11  ;;  %876 = vmatprep.subr.mxu1 %v2620_v12 }
 0x14e   :  { %806 = vmatpush1.msra.mxu0 %v2629_v13  ;;  %877 = vmatpush1.msra.mxu1 %v2634_v14 }
 0x14f   :  { %807 = vmatprep.subr.mxu0 %v2646_v16  ;;  %878 = vmatprep.subr.mxu1 %v2651_v17 }
 0x150   :  { %808 = vmatpush1.msra.mxu0 %v2658_v18  ;;  %879 = vmatpush1.msra.mxu1 %v2663_v19 }
 0x151   :  { %809 = vmatprep.subr.mxu0 %v3964_v22  ;;  %880 = vmatprep.subr.mxu1 %v3965_v30 }
 0x152   :  { %810 = vmatpush1.msra.mxu0 %v3966_v60  ;;  %881 = vmatpush1.msra.mxu1 %v3967_v15 }
 0x153   :  { %811 = vmatprep.subr.mxu0 %v3968_v3  ;;  %882 = vmatprep.subr.mxu1 %v3969_v34  ;;  %v3990_v34 = vld [vmem:[#allocation26_spill] sm:$0xff] }
 0x154   :  { %812 = vmatpush1.msra.mxu0 %v3970_v31  ;;  %883 = vmatpush1.msra.mxu1 %v3971_v42  ;;  %v3989_v31 = vld [vmem:[#allocation28_spill] sm:$0xff] }
 0x155   :  { %813 = vmatprep.subr.mxu0 %v3972_v29  ;;  %884 = vmatprep.subr.mxu1 %v3973_v32 }
 0x156   :  { %814 = vmatpush1.msra.mxu0 %v3974_v24  ;;  %885 = vmatpush1.msra.mxu1 %v3975_v27  ;;  %v3985_v27 = vld [vmem:[#allocation3_spill] sm:$0xff] }
 0x157   :  { %815 = vmatprep.subr.mxu0 %v3976_v26  ;;  %886 = vmatprep.subr.mxu1 %v3977_v20  ;;  %v3986_v26 = vld [vmem:[#allocation4_spill] sm:$0xff] }
 0x158   :  { %816 = vmatpush1.msra.mxu0 %v3978_v25  ;;  %887 = vmatpush1.msra.mxu1 %v3979_v23  ;;  %v3987_v25 = vld [vmem:[#allocation25_spill] sm:$0xff] }
 0x159   :  { %817 = vmatprep.subr.mxu0 %v3980_v28  ;;  %888 = vmatprep.subr.mxu1 %v3981_v33  ;;  %v3988_v28 = vld [vmem:[#allocation27_spill] sm:$0xff] }
 0x15a   :  { %818 = vmatpush1.msra.mxu0 %v3982_v35  ;;  %851 = vmatprep.mubr.f32.mxu0 %v3983_v21 }
 0x15b   :  { %889 = vmatpush1.msra.mxu1 %v3984_v6  ;;  %922 = vmatprep.mubr.f32.mxu1 %v3983_v21 }
 0x15c   :  { %961 = vmatprep.subr.mxu0 %v3985_v27  ;;  %1032 = vmatprep.subr.mxu1 %v3986_v26 }
 0x1fb   :  { %v679_v20 = vpop.f32.mrf.mxu0  ;;  %v750_v33 = vpop.f32.mrf.mxu1 }
 0x1fc   :  { %v755_v24 = vadd.f32 %v679_v20, %v3987_v25  ;;  %v757_v21 = vadd.f32 %v750_v33, %v3990_v34 }
 0x1fd   :  { %v681_v23 = vpop.f32.mrf.mxu0  ;;  %v752_v42 = vpop.f32.mrf.mxu1 }
 0x1fe   :  { %v1954_v32 = vmul.f32 -1.442695, %v755_v24  ;;  %v756_v29 = vadd.f32 %v681_v23, %v3988_v28  ;;  %v758_v6 = vadd.f32 %v752_v42, %v3989_v31 }
 0x200   :  { %2046 = vpow2.f32 %v1954_v32  ;;  %v1955_v35 = vmul.f32 -1.442695, %v756_v29  ;;  %v1956_v3 = vmul.f32 -1.442695, %v758_v6  ;;  %v4013_v6 = vld [vmem:[#allocation32_spill] sm:$0xff] }
 0x202   :  { %2048 = vpow2.f32 %v1955_v35 }
 0x203   :  { %2050 = vtanh.f32 %v757_v21 }
 0x204   :  { %2052 = vpow2.f32 %v1956_v3 }
 0x20d   :  { %v2047_v27 = vpop.eup %2046 }
 0x20e   :  { %v762_v15 = vadd.f32 1.0, %v2047_v27 }
 0x20f   :  { %v2049_v26 = vpop.eup %2048 }
 0x210   :  { %2054 = vrcp.f32 %v762_v15  ;;  %v768_v20 = vadd.f32 1.0, %v2049_v26  ;;  %v2051_v24 = vpop.eup %2050  ;;  %v4014_v26 = vld [vmem:[#allocation30_spill] sm:$0xff] }
 0x211   :  { %v2053_v25 = vpop.eup %2052 }
 0x212   :  { %2056 = vrcp.f32 %v768_v20  ;;  %v775_v28 = vadd.f32 1.0, %v2053_v25 }
 0x214   :  { %2058 = vrcp.f32 %v775_v28 }
 0x21d   :  { %v2055_v32 = vpop.eup %2054 }
 0x21e   :  { %v779_v23 = vmul.f32 %v2055_v32, %v2051_v24 }
 0x21f   :  { %v2057_v29 = vpop.eup %2056 }
 0x220   :  { %v778_v35 = vmul.f32 %v2057_v29, %v2968_v51 }
 0x221   :  { %v2059_v34 = vpop.eup %2058 }
 0x222   :  { %v3042_v31 = vadd.f32 %v779_v23, %v778_v35 }
 0x224   :  { %2060 = vtanh.f32 %v3042_v31 }
 0x231   :  { %v2061_v42 = vpop.eup %2060 }
 0x232   :  { %v782_v33 = vmul.f32 %v2061_v42, %v2059_v34 }
 0x234   :  { %852 = vmatmul.mubr.f32.vlgmr.msra.gmra.mxu0 %v782_v33  ;;  %923 = vmatmul.mubr.f32.vlgmr.msra.gmra.mxu1 %v782_v33 }
 0x235   :  { %962 = vmatpush1.msra.mxu0 %v2383_v36  ;;  %1033 = vmatpush1.msra.mxu1 %v2388_v37  ;;  %v3991_v36 = vld [vmem:[#allocation8_spill] sm:$0xff]  ;;  %v3992_v37 = vld [vmem:[#allocation9_spill] sm:$0xff] }
 0x236   :  { %963 = vmatprep.subr.mxu0 %v2395_v38  ;;  %1034 = vmatprep.subr.mxu1 %v2400_v39  ;;  %v3993_v38 = vld [vmem:[#allocation10_spill] sm:$0xff]  ;;  %v3994_v39 = vld [vmem:[#allocation11_spill] sm:$0xff] }
 0x237   :  { %964 = vmatpush1.msra.mxu0 %v2409_v40  ;;  %1035 = vmatpush1.msra.mxu1 %v2414_v41  ;;  %v3995_v40 = vld [vmem:[#allocation12_spill] sm:$0xff]  ;;  %v3996_v41 = vld [vmem:[#allocation13_spill] sm:$0xff] }
 0x238   :  { %965 = vmatprep.subr.mxu0 %v2426_v43  ;;  %1036 = vmatprep.subr.mxu1 %v2431_v44  ;;  %v3997_v43 = vld [vmem:[#allocation14_spill] sm:$0xff]  ;;  %v3998_v44 = vld [vmem:[#allocation15_spill] sm:$0xff] }
 0x239   :  { %966 = vmatpush1.msra.mxu0 %v2438_v45  ;;  %1037 = vmatpush1.msra.mxu1 %v2443_v46  ;;  %v3999_v45 = vld [vmem:[#allocation16_spill] sm:$0xff]  ;;  %v4000_v46 = vld [vmem:[#allocation17_spill] sm:$0xff] }
 0x23a   :  { %967 = vmatprep.subr.mxu0 %v2450_v47  ;;  %1038 = vmatprep.subr.mxu1 %v2455_v48  ;;  %v4001_v47 = vld [vmem:[#allocation18_spill] sm:$0xff]  ;;  %v4002_v48 = vld [vmem:[#allocation19_spill] sm:$0xff] }
 0x23b   :  { %968 = vmatpush1.msra.mxu0 %v2464_v49  ;;  %1039 = vmatpush1.msra.mxu1 %v2469_v50  ;;  %v4003_v49 = vld [vmem:[#allocation20_spill] sm:$0xff]  ;;  %v4004_v50 = vld [vmem:[#allocation21_spill] sm:$0xff] }
 0x23c   :  { %969 = vmatprep.subr.mxu0 %v2481_v52  ;;  %1040 = vmatprep.subr.mxu1 %v2486_v53  ;;  %v4005_v52 = vld [vmem:[#allocation22_spill] sm:$0xff]  ;;  %v4006_v53 = vld [vmem:[#allocation23_spill] sm:$0xff] }
 0x23d   :  { %970 = vmatpush1.msra.mxu0 %v2493_v54  ;;  %1041 = vmatpush1.msra.mxu1 %v2498_v55  ;;  %v4007_v54 = vmov 0.0   ;;  %v4008_v55 = vld [vmem:[#allocation24_spill] sm:$0xff] }
 0x23e   :  { %971 = vmatprep.subr.mxu0 %v2505_v56  ;;  %1042 = vmatprep.subr.mxu1 %v2510_v57  ;;  %v3112_v56 = vld [vmem:[%s3817_s2 + $0x1e8] sm:$0xff]  ;;  %v3118_v57 = vld [vmem:[%s3817_s2 + $0x1f8] sm:$0xff] }
 0x23f   :  { %972 = vmatpush1.msra.mxu0 %v2519_v58  ;;  %1043 = vmatpush1.msra.mxu1 %v2524_v59  ;;  %4009 = vst [vmem:[#allocation5_spill] sm:$0xff] %v3112_v56  ;;  %4010 = vst [vmem:[#allocation6_spill] sm:$0xff] %v3118_v57  ;;  %v4011_v59 = vld [vmem:[#allocation29_spill] sm:$0xff] }
 0x240   :  { %973 = vmatprep.subr.mxu0 %v2536_v61  ;;  %1044 = vmatprep.subr.mxu1 %v2541_v62 }
 0x241   :  { %974 = vmatpush1.msra.mxu0 %v2548_v63  ;;  %1045 = vmatpush1.msra.mxu1 %v2553_v0  ;;  %v4012_v0 = vld [vmem:[#allocation31_spill] sm:$0xff] }
 0x242   :  { %975 = vmatprep.subr.mxu0 %v2560_v1  ;;  %1046 = vmatprep.subr.mxu1 %v2565_v2 }
 0x243   :  { %976 = vmatpush1.msra.mxu0 %v2574_v4  ;;  %1047 = vmatpush1.msra.mxu1 %v2579_v5 }
 0x244   :  { %977 = vmatprep.subr.mxu0 %v2591_v7  ;;  %1048 = vmatprep.subr.mxu1 %v2596_v8 }
 0x245   :  { %978 = vmatpush1.msra.mxu0 %v2603_v9  ;;  %1049 = vmatpush1.msra.mxu1 %v2608_v10 }
 0x246   :  { %979 = vmatprep.subr.mxu0 %v2615_v11  ;;  %1050 = vmatprep.subr.mxu1 %v2620_v12 }
 0x247   :  { %980 = vmatpush1.msra.mxu0 %v2629_v13  ;;  %1051 = vmatpush1.msra.mxu1 %v2634_v14 }
 0x248   :  { %981 = vmatprep.subr.mxu0 %v2646_v16  ;;  %1052 = vmatprep.subr.mxu1 %v2651_v17 }
 0x249   :  { %982 = vmatpush1.msra.mxu0 %v2658_v18  ;;  %1053 = vmatpush1.msra.mxu1 %v2663_v19 }
 0x24a   :  { %983 = vmatprep.subr.mxu0 %v3964_v22  ;;  %1054 = vmatprep.subr.mxu1 %v3965_v30 }
 0x24b   :  { %984 = vmatpush1.msra.mxu0 %v3966_v60  ;;  %1055 = vmatpush1.msra.mxu1 %v3991_v36 }
 0x24c   :  { %985 = vmatprep.subr.mxu0 %v3992_v37  ;;  %1056 = vmatprep.subr.mxu1 %v3993_v38 }
 0x24d   :  { %986 = vmatpush1.msra.mxu0 %v3994_v39  ;;  %1057 = vmatpush1.msra.mxu1 %v3995_v40 }
 0x24e   :  { %987 = vmatprep.subr.mxu0 %v3996_v41  ;;  %1058 = vmatprep.subr.mxu1 %v3997_v43 }
 0x24f   :  { %988 = vmatpush1.msra.mxu0 %v3998_v44  ;;  %1059 = vmatpush1.msra.mxu1 %v3999_v45 }
 0x250   :  { %989 = vmatprep.subr.mxu0 %v4000_v46  ;;  %1060 = vmatprep.subr.mxu1 %v4001_v47 }
 0x251   :  { %990 = vmatpush1.msra.mxu0 %v4002_v48  ;;  %1061 = vmatpush1.msra.mxu1 %v4003_v49 }
 0x252   :  { %991 = vmatprep.subr.mxu0 %v4004_v50  ;;  %1062 = vmatprep.subr.mxu1 %v4005_v52 }
 0x253   :  { %992 = vmatpush1.msra.mxu0 %v4006_v53  ;;  %1025 = vmatprep.mubr.f32.mxu0 %v4007_v54 }
 0x254   :  { %1063 = vmatpush1.msra.mxu1 %v4008_v55  ;;  %1096 = vmatprep.mubr.f32.mxu1 %v4007_v54 }
 0x255   :  { %1135 = vmatprep.subr.mxu0 %v3112_v56  ;;  %1206 = vmatprep.subr.mxu1 %v3118_v57 }
 0x2f4   :  { %v853_v58 = vpop.f32.mrf.mxu0  ;;  %v924_v15 = vpop.f32.mrf.mxu1 }
 0x2f5   :  { %v929_v61 = vadd.f32 %v853_v58, %v4011_v59  ;;  %v931_v20 = vadd.f32 %v924_v15, %v4014_v26  ;;  %v3144_v15 = vld [vmem:[%s3817_s2 + $0x1c8] sm:$0xff]  ;;  %v3174_v26 = vld [vmem:[%s3817_s2 + $0x1b8] sm:$0xff] }
 0x2f6   :  { %v855_v62 = vpop.f32.mrf.mxu0  ;;  %v926_v21 = vpop.f32.mrf.mxu1 }
 0x2f7   :  { %v1957_v63 = vmul.f32 -1.442695, %v929_v61  ;;  %v930_v51 = vadd.f32 %v855_v62, %v4012_v0  ;;  %v932_v27 = vadd.f32 %v926_v21, %v4013_v6  ;;  %v3156_v21 = vld [vmem:[%s3817_s2 + $0x1c0] sm:$0xff]  ;;  %v3162_v6 = vld [vmem:[%s3817_s2 + $0x1d0] sm:$0xff] }
 0x2f9   :  { %2062 = vpow2.f32 %v1957_v63  ;;  %v1958_v3 = vmul.f32 -1.442695, %v930_v51  ;;  %v1959_v24 = vmul.f32 -1.442695, %v932_v27  ;;  %v3132_v51 = vld [vmem:[%s3817_s2 + $0x1e0] sm:$0xff]  ;;  %v3168_v27 = vld [vmem:[%s3817_s2 + $0x1a8] sm:$0xff] }
 0x2fb   :  { %2064 = vpow2.f32 %v1958_v3  ;;  %v3150_v3 = vld [vmem:[%s3817_s2 + $0x1d8] sm:$0xff] }
 0x2fc   :  { %2066 = vtanh.f32 %v931_v20  ;;  %v3180_v20 = vld [vmem:[%s3817_s2 + $0x1a0] sm:$0xff] }
 0x2fd   :  { %2068 = vpow2.f32 %v1959_v24  ;;  %v3186_v24 = vld [vmem:[%s3817_s2 + $0x1b0] sm:$0xff] }
 0x306   :  { %v2063_v25 = vpop.eup %2062 }
 0x307   :  { %v936_v32 = vadd.f32 1.0, %v2063_v25  ;;  %v3192_v25 = vld [vmem:[%s3817_s2 + $0x188] sm:$0xff] }
 0x308   :  { %v2065_v23 = vpop.eup %2064 }
 0x309   :  { %2070 = vrcp.f32 %v936_v32  ;;  %v942_v29 = vadd.f32 1.0, %v2065_v23  ;;  %v2067_v28 = vpop.eup %2066  ;;  %v3198_v32 = vld [vmem:[%s3817_s2 + $0x198] sm:$0xff]  ;;  %v3204_v23 = vld [vmem:[%s3817_s2 + $0x180] sm:$0xff] }
 0x30a   :  { %v2069_v35 = vpop.eup %2068 }
 0x30b   :  { %2072 = vrcp.f32 %v942_v29  ;;  %v949_v58 = vadd.f32 1.0, %v2069_v35  ;;  %v3210_v29 = vld [vmem:[%s3817_s2 + $0x190] sm:$0xff]  ;;  %v3222_v35 = vld [vmem:[%s3817_s2 + $0x178] sm:$0xff] }
 0x30d   :  { %2074 = vrcp.f32 %v949_v58  ;;  %v3246_v58 = vld [vmem:[%s3817_s2 + $0x158] sm:$0xff] }
 0x316   :  { %v2071_v34 = vpop.eup %2070 }
 0x317   :  { %v953_v42 = vmul.f32 %v2071_v34, %v2067_v28  ;;  %v3216_v28 = vld [vmem:[%s3817_s2 + $0x168] sm:$0xff]  ;;  %v3228_v34 = vld [vmem:[%s3817_s2 + $0x160] sm:$0xff] }
 0x318   :  { %v2073_v33 = vpop.eup %2072 }
 0x319   :  { %v952_v59 = vmul.f32 %v2073_v33, %v3042_v31  ;;  %v3138_v31 = vld [vmem:[%s3817_s2 + $0x1f0] sm:$0xff]  ;;  %v3240_v33 = vld [vmem:[%s3817_s2 + $0x148] sm:$0xff] }
 0x31a   :  { %v2075_v62 = vpop.eup %2074 }
 0x31b   :  { %v3126_v61 = vadd.f32 %v953_v42, %v952_v59  ;;  %v3234_v42 = vld [vmem:[%s3817_s2 + $0x170] sm:$0xff]  ;;  %v3252_v59 = vld [vmem:[%s3817_s2 + $0x140] sm:$0xff] }
 0x31c   :  { %4015 = vst [vmem:[#allocation7_spill] sm:$0xff] %v3252_v59 }
 0x31d   :  { %2076 = vtanh.f32 %v3126_v61 }
 0x32a   :  { %v2077_v63 = vpop.eup %2076 }
 0x32b   :  { %v956_v0 = vmul.f32 %v2077_v63, %v2075_v62  ;;  %v3258_v62 = vld [vmem:[%s3817_s2 + $0x150] sm:$0xff]  ;;  %v3264_v63 = vld [vmem:[%s3817_s2 + $0x128] sm:$0xff] }
 0x32c   :  { %4016 = vst [vmem:[#allocation3_spill] sm:$0xff] %v3258_v62 }
 0x32d   :  { %1026 = vmatmul.mubr.f32.vlgmr.msra.gmra.mxu0 %v956_v0  ;;  %1097 = vmatmul.mubr.f32.vlgmr.msra.gmra.mxu1 %v956_v0  ;;  %v3270_v0 = vld [vmem:[%s3817_s2 + $0x138] sm:$0xff] }
 0x32e   :  { %1136 = vmatpush1.msra.mxu0 %v3132_v51  ;;  %1207 = vmatpush1.msra.mxu1 %v3138_v31 }
 0x32f   :  { %1137 = vmatprep.subr.mxu0 %v3144_v15  ;;  %1208 = vmatprep.subr.mxu1 %v3150_v3 }
 0x330   :  { %1138 = vmatpush1.msra.mxu0 %v3156_v21  ;;  %1209 = vmatpush1.msra.mxu1 %v3162_v6 }
 0x331   :  { %1139 = vmatprep.subr.mxu0 %v3168_v27  ;;  %1210 = vmatprep.subr.mxu1 %v3174_v26 }
 0x332   :  { %1140 = vmatpush1.msra.mxu0 %v3180_v20  ;;  %1211 = vmatpush1.msra.mxu1 %v3186_v24 }
 0x333   :  { %1141 = vmatprep.subr.mxu0 %v3192_v25  ;;  %1212 = vmatprep.subr.mxu1 %v3198_v32 }
 0x334   :  { %1142 = vmatpush1.msra.mxu0 %v3204_v23  ;;  %1213 = vmatpush1.msra.mxu1 %v3210_v29 }
 0x335   :  { %1143 = vmatprep.subr.mxu0 %v3216_v28  ;;  %1214 = vmatprep.subr.mxu1 %v3222_v35 }
 0x336   :  { %1144 = vmatpush1.msra.mxu0 %v3228_v34  ;;  %1215 = vmatpush1.msra.mxu1 %v3234_v42 }
 0x337   :  { %1145 = vmatprep.subr.mxu0 %v3240_v33  ;;  %1216 = vmatprep.subr.mxu1 %v3246_v58 }
 0x338   :  { %1146 = vmatpush1.msra.mxu0 %v3252_v59  ;;  %1217 = vmatpush1.msra.mxu1 %v3258_v62  ;;  %v3276_v59 = vld [vmem:[%s3817_s2 + $0x120] sm:$0xff]  ;;  %v3282_v62 = vld [vmem:[%s3817_s2 + $0x130] sm:$0xff] }
 0x339   :  { %1147 = vmatprep.subr.mxu0 %v3264_v63  ;;  %1218 = vmatprep.subr.mxu1 %v3270_v0 }
 0x33a   :  { %1148 = vmatpush1.msra.mxu0 %v3276_v59  ;;  %1219 = vmatpush1.msra.mxu1 %v3282_v62 }
 0x33b   :  { %1149 = vmatprep.subr.mxu0 %v2560_v1  ;;  %1220 = vmatprep.subr.mxu1 %v2565_v2  ;;  %v4017_v2 = vld [vmem:[#allocation33_spill] sm:$0xff] }
 0x33c   :  { %1150 = vmatpush1.msra.mxu0 %v2574_v4  ;;  %1221 = vmatpush1.msra.mxu1 %v2579_v5 }
 0x33d   :  { %1151 = vmatprep.subr.mxu0 %v2591_v7  ;;  %1222 = vmatprep.subr.mxu1 %v2596_v8  ;;  %v4018_v8 = vld [vmem:[#allocation35_spill] sm:$0xff] }
 0x33e   :  { %1152 = vmatpush1.msra.mxu0 %v2603_v9  ;;  %1223 = vmatpush1.msra.mxu1 %v2608_v10 }
 0x33f   :  { %1153 = vmatprep.subr.mxu0 %v2615_v11  ;;  %1224 = vmatprep.subr.mxu1 %v2620_v12 }
 0x340   :  { %1154 = vmatpush1.msra.mxu0 %v2629_v13  ;;  %1225 = vmatpush1.msra.mxu1 %v2634_v14  ;;  %v4019_v13 = vld [vmem:[#allocation36_spill] sm:$0xff] }
 0x341   :  { %1155 = vmatprep.subr.mxu0 %v2646_v16  ;;  %1226 = vmatprep.subr.mxu1 %v2651_v17  ;;  %v4020_v16 = vld [vmem:[#allocation34_spill] sm:$0xff] }
 0x342   :  { %1156 = vmatpush1.msra.mxu0 %v2658_v18  ;;  %1227 = vmatpush1.msra.mxu1 %v2663_v19 }
 0x343   :  { %1157 = vmatprep.subr.mxu0 %v3964_v22  ;;  %1228 = vmatprep.subr.mxu1 %v3965_v30 }
 0x344   :  { %1158 = vmatpush1.msra.mxu0 %v3966_v60  ;;  %1229 = vmatpush1.msra.mxu1 %v3991_v36 }
 0x345   :  { %1159 = vmatprep.subr.mxu0 %v3992_v37  ;;  %1230 = vmatprep.subr.mxu1 %v3993_v38 }
 0x346   :  { %1160 = vmatpush1.msra.mxu0 %v3994_v39  ;;  %1231 = vmatpush1.msra.mxu1 %v3995_v40 }
 0x347   :  { %1161 = vmatprep.subr.mxu0 %v3996_v41  ;;  %1232 = vmatprep.subr.mxu1 %v3997_v43 }
 0x348   :  { %1162 = vmatpush1.msra.mxu0 %v3998_v44  ;;  %1233 = vmatpush1.msra.mxu1 %v3999_v45 }
 0x349   :  { %1163 = vmatprep.subr.mxu0 %v4000_v46  ;;  %1234 = vmatprep.subr.mxu1 %v4001_v47 }
 0x34a   :  { %1164 = vmatpush1.msra.mxu0 %v4002_v48  ;;  %1235 = vmatpush1.msra.mxu1 %v4003_v49  ;;  %v4021_v48 = vld [vmem:[#allocation7_spill] sm:$0xff] }
 0x34b   :  { %1165 = vmatprep.subr.mxu0 %v4004_v50  ;;  %1236 = vmatprep.subr.mxu1 %v4005_v52  ;;  %v4022_v49 = vld [vmem:[#allocation3_spill] sm:$0xff]  ;;  %v3362_v50 = vld [vmem:[%s3817_s2 + $0x108] sm:$0xff]  ;;  %v3368_v52 = vld [vmem:[%s3817_s2 + $0x118] sm:$0xff] }
 0x34c   :  { %1166 = vmatpush1.msra.mxu0 %v4006_v53  ;;  %1199 = vmatprep.mubr.f32.mxu0 %v4007_v54  ;;  %v3374_v53 = vld [vmem:[%s3817_s2 + $0x100] sm:$0xff] }
 0x34d   :  { %1237 = vmatpush1.msra.mxu1 %v4008_v55  ;;  %1270 = vmatprep.mubr.f32.mxu1 %v4007_v54  ;;  %v3380_v55 = vld [vmem:[%s3817_s2 + $0x110] sm:$0xff] }
 0x34e   :  { %1309 = vmatprep.subr.mxu0 %v3112_v56  ;;  %1380 = vmatprep.subr.mxu1 %v3118_v57 }
 0x3ed   :  { %v1027_v1 = vpop.f32.mrf.mxu0  ;;  %v1098_v10 = vpop.f32.mrf.mxu1 }
 0x3ee   :  { %v1103_v4 = vadd.f32 %v1027_v1, %v4017_v2  ;;  %v1105_v17 = vadd.f32 %v1098_v10, %v4020_v16  ;;  %v3392_v1 = vld [vmem:[%s3817_s2 + $0xf8] sm:$0xff]  ;;  %v3398_v2 = vld [vmem:[%s3817_s2 + $0xe0] sm:$0xff]  ;;  %v3434_v10 = vld [vmem:[%s3817_s2 + $0xa8] sm:$0xff] }
 0x3ef   :  { %v1029_v5 = vpop.f32.mrf.mxu0  ;;  %v1100_v12 = vpop.f32.mrf.mxu1  ;;  %v3464_v16 = vld [vmem:[%s3817_s2 + $0x98] sm:$0xff] }
 0x3f0   :  { %v1960_v7 = vmul.f32 -1.442695, %v1103_v4  ;;  %v1104_v9 = vadd.f32 %v1029_v5, %v4018_v8  ;;  %v1106_v14 = vadd.f32 %v1100_v12, %v4019_v13  ;;  %v3404_v4 = vld [vmem:[%s3817_s2 + $0xf0] sm:$0xff]  ;;  %v3410_v5 = vld [vmem:[%s3817_s2 + $0xc8] sm:$0xff]  ;;  %v3422_v8 = vld [vmem:[%s3817_s2 + $0xc0] sm:$0xff] }
 0x3f1   :  { %v3446_v12 = vld [vmem:[%s3817_s2 + $0xa0] sm:$0xff]  ;;  %v3452_v13 = vld [vmem:[%s3817_s2 + $0xb0] sm:$0xff] }
 0x3f2   :  { %2078 = vpow2.f32 %v1960_v7  ;;  %v1961_v11 = vmul.f32 -1.442695, %v1104_v9  ;;  %v1962_v18 = vmul.f32 -1.442695, %v1106_v14  ;;  %v3416_v7 = vld [vmem:[%s3817_s2 + $0xd8] sm:$0xff]  ;;  %v3428_v9 = vld [vmem:[%s3817_s2 + $0xd0] sm:$0xff] }
 0x3f3   :  { %v3458_v14 = vld [vmem:[%s3817_s2 + $0x88] sm:$0xff] }
 0x3f4   :  { %2080 = vpow2.f32 %v1961_v11  ;;  %v3440_v11 = vld [vmem:[%s3817_s2 + $0xb8] sm:$0xff] }
 0x3f5   :  { %2082 = vtanh.f32 %v1105_v17  ;;  %v3470_v17 = vld [vmem:[%s3817_s2 + $0x80] sm:$0xff] }
 0x3f6   :  { %2084 = vpow2.f32 %v1962_v18  ;;  %v3476_v18 = vld [vmem:[%s3817_s2 + $0x90] sm:$0xff] }
 0x3f7   :  { %4023 = vst [vmem:[#allocation4_spill] sm:$0xff] %v3476_v18 }
 0x3ff   :  { %v2079_v19 = vpop.eup %2078 }
 0x400   :  { %v1110_v22 = vadd.f32 1.0, %v2079_v19  ;;  %v3482_v19 = vld [vmem:[%s3817_s2 + $0x68] sm:$0xff] }
 0x401   :  { %v2081_v30 = vpop.eup %2080  ;;  %4024 = vst [vmem:[#allocation25_spill] sm:$0xff] %v3482_v19 }
 0x402   :  { %2086 = vrcp.f32 %v1110_v22  ;;  %v1116_v60 = vadd.f32 1.0, %v2081_v30  ;;  %v2083_v36 = vpop.eup %2082  ;;  %v3488_v22 = vld [vmem:[%s3817_s2 + $0x78] sm:$0xff]  ;;  %v3494_v30 = vld [vmem:[%s3817_s2 + $0x60] sm:$0xff] }
 0x403   :  { %v2085_v37 = vpop.eup %2084  ;;  %4025 = vst [vmem:[#allocation27_spill] sm:$0xff] %v3488_v22  ;;  %4026 = vst [vmem:[#allocation28_spill] sm:$0xff] %v3494_v30 }
 0x404   :  { %2088 = vrcp.f32 %v1116_v60  ;;  %v1123_v41 = vadd.f32 1.0, %v2085_v37  ;;  %v3500_v60 = vld [vmem:[%s3817_s2 + $0x70] sm:$0xff]  ;;  %v3512_v37 = vld [vmem:[%s3817_s2 + $0x58] sm:$0xff] }
 0x405   :  { %4027 = vst [vmem:[#allocation26_spill] sm:$0xff] %v3500_v60  ;;  %4029 = vst [vmem:[#allocation9_spill] sm:$0xff] %v3512_v37 }
 0x406   :  { %2090 = vrcp.f32 %v1123_v41  ;;  %v3536_v41 = vld [vmem:[%s3817_s2 + $0x38] sm:$0xff] }
 0x407   :  { %4033 = vst [vmem:[#allocation13_spill] sm:$0xff] %v3536_v41 }
 0x40f   :  { %v2087_v38 = vpop.eup %2086 }
 0x410   :  { %v1127_v39 = vmul.f32 %v2087_v38, %v2083_v36  ;;  %v3506_v36 = vld [vmem:[%s3817_s2 + $0x48] sm:$0xff]  ;;  %v3518_v38 = vld [vmem:[%s3817_s2 + $0x40] sm:$0xff] }
 0x411   :  { %v2089_v40 = vpop.eup %2088  ;;  %4028 = vst [vmem:[#allocation8_spill] sm:$0xff] %v3506_v36  ;;  %4030 = vst [vmem:[#allocation10_spill] sm:$0xff] %v3518_v38 }
 0x412   :  { %v1126_v43 = vmul.f32 %v2089_v40, %v3126_v61  ;;  %v3386_v61 = vld [vmem:[%s3817_s2 + $0xe8] sm:$0xff] }
 0x413   :  { %v2091_v45 = vpop.eup %2090  ;;  %v3530_v40 = vld [vmem:[%s3817_s2 + $0x28] sm:$0xff] }
 0x414   :  { %v3330_v44 = vadd.f32 %v1127_v39, %v1126_v43  ;;  %v3524_v39 = vld [vmem:[%s3817_s2 + $0x50] sm:$0xff]  ;;  %4032 = vst [vmem:[#allocation12_spill] sm:$0xff] %v3530_v40  ;;  %v3542_v43 = vld [vmem:[%s3817_s2 + $0x20] sm:$0xff] }
 0x415   :  { %4031 = vst [vmem:[#allocation11_spill] sm:$0xff] %v3524_v39  ;;  %4034 = vst [vmem:[#allocation14_spill] sm:$0xff] %v3542_v43 }
 0x416   :  { %2092 = vtanh.f32 %v3330_v44 }
 0x423   :  { %v2093_v46 = vpop.eup %2092 }
 0x424   :  { %v1130_v47 = vmul.f32 %v2093_v46, %v2091_v45  ;;  %v3548_v45 = vld [vmem:[%s3817_s2 + $0x30] sm:$0xff]  ;;  %v3554_v46 = vld [vmem:[%s3817_s2 + $0x8] sm:$0xff] }
 0x425   :  { %4035 = vst [vmem:[#allocation15_spill] sm:$0xff] %v3548_v45  ;;  %4036 = vst [vmem:[#allocation16_spill] sm:$0xff] %v3554_v46 }
 0x426   :  { %1200 = vmatmul.mubr.f32.vlgmr.msra.gmra.mxu0 %v1130_v47  ;;  %1271 = vmatmul.mubr.f32.vlgmr.msra.gmra.mxu1 %v1130_v47  ;;  %v3560_v47 = vld [vmem:[%s3817_s2 + $0x18] sm:$0xff] }
 0x427   :  { %1310 = vmatpush1.msra.mxu0 %v3132_v51  ;;  %1381 = vmatpush1.msra.mxu1 %v3138_v31  ;;  %4037 = vst [vmem:[#allocation17_spill] sm:$0xff] %v3560_v47 }
 0x428   :  { %1311 = vmatprep.subr.mxu0 %v3144_v15  ;;  %1382 = vmatprep.subr.mxu1 %v3150_v3 }
 0x429   :  { %1312 = vmatpush1.msra.mxu0 %v3156_v21  ;;  %1383 = vmatpush1.msra.mxu1 %v3162_v6 }
 0x42a   :  { %1313 = vmatprep.subr.mxu0 %v3168_v27  ;;  %1384 = vmatprep.subr.mxu1 %v3174_v26 }
 0x42b   :  { %1314 = vmatpush1.msra.mxu0 %v3180_v20  ;;  %1385 = vmatpush1.msra.mxu1 %v3186_v24 }
 0x42c   :  { %1315 = vmatprep.subr.mxu0 %v3192_v25  ;;  %1386 = vmatprep.subr.mxu1 %v3198_v32 }
 0x42d   :  { %1316 = vmatpush1.msra.mxu0 %v3204_v23  ;;  %1387 = vmatpush1.msra.mxu1 %v3210_v29 }
 0x42e   :  { %1317 = vmatprep.subr.mxu0 %v3216_v28  ;;  %1388 = vmatprep.subr.mxu1 %v3222_v35 }
 0x42f   :  { %1318 = vmatpush1.msra.mxu0 %v3228_v34  ;;  %1389 = vmatpush1.msra.mxu1 %v3234_v42 }
 0x430   :  { %1319 = vmatprep.subr.mxu0 %v3240_v33  ;;  %1390 = vmatprep.subr.mxu1 %v3246_v58 }
 0x431   :  { %1320 = vmatpush1.msra.mxu0 %v4021_v48  ;;  %1391 = vmatpush1.msra.mxu1 %v4022_v49 }
 0x432   :  { %1321 = vmatprep.subr.mxu0 %v3264_v63  ;;  %1392 = vmatprep.subr.mxu1 %v3270_v0 }
 0x433   :  { %1322 = vmatpush1.msra.mxu0 %v3276_v59  ;;  %1393 = vmatpush1.msra.mxu1 %v3282_v62 }
 0x434   :  { %1323 = vmatprep.subr.mxu0 %v3362_v50  ;;  %1394 = vmatprep.subr.mxu1 %v3368_v52 }
 0x435   :  { %1324 = vmatpush1.msra.mxu0 %v3374_v53  ;;  %1395 = vmatpush1.msra.mxu1 %v3380_v55 }
 0x436   :  { %1325 = vmatprep.subr.mxu0 %v3386_v61  ;;  %1396 = vmatprep.subr.mxu1 %v3392_v1 }
 0x437   :  { %1326 = vmatpush1.msra.mxu0 %v3398_v2  ;;  %1397 = vmatpush1.msra.mxu1 %v3404_v4 }
 0x438   :  { %1327 = vmatprep.subr.mxu0 %v3410_v5  ;;  %1398 = vmatprep.subr.mxu1 %v3416_v7 }
 0x439   :  { %1328 = vmatpush1.msra.mxu0 %v3422_v8  ;;  %1399 = vmatpush1.msra.mxu1 %v3428_v9 }
 0x43a   :  { %1329 = vmatprep.subr.mxu0 %v3434_v10  ;;  %1400 = vmatprep.subr.mxu1 %v3440_v11 }
 0x43b   :  { %1330 = vmatpush1.msra.mxu0 %v3446_v12  ;;  %1401 = vmatpush1.msra.mxu1 %v3452_v13 }
 0x43c   :  { %1331 = vmatprep.subr.mxu0 %v3458_v14  ;;  %1402 = vmatprep.subr.mxu1 %v3464_v16 }
 0x43d   :  { %1332 = vmatpush1.msra.mxu0 %v3470_v17  ;;  %1403 = vmatpush1.msra.mxu1 %v3476_v18 }
 0x43e   :  { %1333 = vmatprep.subr.mxu0 %v3482_v19  ;;  %1404 = vmatprep.subr.mxu1 %v3488_v22  ;;  %v4043_v22 = vld [vmem:[#allocation38_spill] sm:$0xff] }
 0x43f   :  { %1334 = vmatpush1.msra.mxu0 %v3494_v30  ;;  %1405 = vmatpush1.msra.mxu1 %v3500_v60  ;;  %v4042_v30 = vld [vmem:[#allocation40_spill] sm:$0xff] }
 0x440   :  { %1335 = vmatprep.subr.mxu0 %v3506_v36  ;;  %1406 = vmatprep.subr.mxu1 %v3512_v37 }
 0x441   :  { %1336 = vmatpush1.msra.mxu0 %v3518_v38  ;;  %1407 = vmatpush1.msra.mxu1 %v3524_v39  ;;  %v4041_v39 = vld [vmem:[#allocation39_spill] sm:$0xff] }
 0x442   :  { %1337 = vmatprep.subr.mxu0 %v3530_v40  ;;  %1408 = vmatprep.subr.mxu1 %v3536_v41 }
 0x443   :  { %1338 = vmatpush1.msra.mxu0 %v3542_v43  ;;  %1409 = vmatpush1.msra.mxu1 %v3548_v45  ;;  %v3566_v43 = vld [vmem:[%s3817_s2] sm:$0xff]  ;;  %v4040_v45 = vld [vmem:[#allocation37_spill] sm:$0xff] }
 0x444   :  { %1339 = vmatprep.subr.mxu0 %v3554_v46  ;;  %1410 = vmatprep.subr.mxu1 %v3560_v47  ;;  %4038 = vst [vmem:[#allocation18_spill] sm:$0xff] %v3566_v43  ;;  %v3573_v46 = vld [vmem:[%s3817_s2 + $0x10] sm:$0xff] }
 0x445   :  { %1340 = vmatpush1.msra.mxu0 %v3566_v43  ;;  %1373 = vmatprep.mubr.f32.mxu0 %v4007_v54  ;;  %4039 = vst [vmem:[#allocation19_spill] sm:$0xff] %v3573_v46 }
 0x446   :  { %1411 = vmatpush1.msra.mxu1 %v3573_v46  ;;  %1444 = vmatprep.mubr.f32.mxu1 %v4007_v54 }
 0x447   :  { %1483 = vmatprep.subr.mxu0 %v3112_v56  ;;  %1554 = vmatprep.subr.mxu1 %v3118_v57 }
 0x4e6   :  { %v1201_v47 = vpop.f32.mrf.mxu0  ;;  %v1272_v37 = vpop.f32.mrf.mxu1 }
 0x4e7   :  { %v1277_v41 = vadd.f32 %v1201_v47, %v4040_v45  ;;  %v1279_v54 = vadd.f32 %v1272_v37, %v4043_v22  ;;  %v4049_v37 = vld [vmem:[#allocation8_spill] sm:$0xff] }
 0x4e8   :  { %v1203_v40 = vpop.f32.mrf.mxu0  ;;  %v1274_v60 = vpop.f32.mrf.mxu1 }
 0x4e9   :  { %v1963_v43 = vmul.f32 -1.442695, %v1277_v41  ;;  %v1278_v38 = vadd.f32 %v1203_v40, %v4041_v39  ;;  %v1280_v46 = vadd.f32 %v1274_v60, %v4042_v30  ;;  %v4048_v60 = vld [vmem:[#allocation26_spill] sm:$0xff] }
 0x4eb   :  { %2094 = vpow2.f32 %v1963_v43  ;;  %v1964_v36 = vmul.f32 -1.442695, %v1278_v38  ;;  %v1965_v19 = vmul.f32 -1.442695, %v1280_v46  ;;  %v4050_v46 = vld [vmem:[#allocation9_spill] sm:$0xff] }
 0x4ed   :  { %2096 = vpow2.f32 %v1964_v36 }
 0x4ee   :  { %2098 = vtanh.f32 %v1279_v54 }
 0x4ef   :  { %2100 = vpow2.f32 %v1965_v19  ;;  %v4047_v19 = vld [vmem:[#allocation28_spill] sm:$0xff] }
 0x4f8   :  { %v2095_v56 = vpop.eup %2094 }
 0x4f9   :  { %v1284_v18 = vadd.f32 1.0, %v2095_v56 }
 0x4fa   :  { %v2097_v57 = vpop.eup %2096 }
 0x4fb   :  { %2102 = vrcp.f32 %v1284_v18  ;;  %v1290_v45 = vadd.f32 1.0, %v2097_v57  ;;  %v2099_v41 = vpop.eup %2098  ;;  %v4044_v57 = vld [vmem:[#allocation4_spill] sm:$0xff]  ;;  %v4046_v18 = vld [vmem:[#allocation27_spill] sm:$0xff] }
 0x4fc   :  { %v2101_v39 = vpop.eup %2100 }
 0x4fd   :  { %2104 = vrcp.f32 %v1290_v45  ;;  %v1297_v36 = vadd.f32 1.0, %v2101_v39  ;;  %v4051_v45 = vld [vmem:[#allocation10_spill] sm:$0xff]  ;;  %v4053_v39 = vld [vmem:[#allocation12_spill] sm:$0xff] }
 0x4ff   :  { %2106 = vrcp.f32 %v1297_v36  ;;  %v4057_v36 = vld [vmem:[#allocation16_spill] sm:$0xff] }
 0x508   :  { %v2103_v40 = vpop.eup %2102 }
 0x509   :  { %v1301_v43 = vmul.f32 %v2103_v40, %v2099_v41  ;;  %v4052_v41 = vld [vmem:[#allocation11_spill] sm:$0xff]  ;;  %v4054_v40 = vld [vmem:[#allocation13_spill] sm:$0xff] }
 0x50a   :  { %v2105_v38 = vpop.eup %2104 }
 0x50b   :  { %v1300_v47 = vmul.f32 %v2105_v38, %v3330_v44  ;;  %v4045_v44 = vld [vmem:[#allocation25_spill] sm:$0xff]  ;;  %v4056_v38 = vld [vmem:[#allocation15_spill] sm:$0xff] }
 0x50c   :  { %v2107_v56 = vpop.eup %2106 }
 0x50d   :  { %v3584_v30 = vadd.f32 %v1301_v43, %v1300_v47  ;;  %v4055_v43 = vld [vmem:[#allocation14_spill] sm:$0xff]  ;;  %v4058_v47 = vld [vmem:[#allocation17_spill] sm:$0xff] }
 0x50f   :  { %2108 = vtanh.f32 %v3584_v30 }
 0x51c   :  { %v2109_v54 = vpop.eup %2108 }
 0x51d   :  { %v1304_v22 = vmul.f32 %v2109_v54, %v2107_v56  ;;  %v4059_v56 = vld [vmem:[#allocation18_spill] sm:$0xff]  ;;  %v4060_v54 = vmov 0.0  }
 0x51f   :  { %1374 = vmatmul.mubr.f32.vlgmr.msra.gmra.mxu0 %v1304_v22  ;;  %1445 = vmatmul.mubr.f32.vlgmr.msra.gmra.mxu1 %v1304_v22  ;;  %v4061_v22 = vld [vmem:[#allocation19_spill] sm:$0xff] }
 0x520   :  { %1484 = vmatpush1.msra.mxu0 %v3132_v51  ;;  %1555 = vmatpush1.msra.mxu1 %v3138_v31 }
 0x521   :  { %1485 = vmatprep.subr.mxu0 %v3144_v15  ;;  %1556 = vmatprep.subr.mxu1 %v3150_v3 }
 0x522   :  { %1486 = vmatpush1.msra.mxu0 %v3156_v21  ;;  %1557 = vmatpush1.msra.mxu1 %v3162_v6 }
 0x523   :  { %1487 = vmatprep.subr.mxu0 %v3168_v27  ;;  %1558 = vmatprep.subr.mxu1 %v3174_v26 }
 0x524   :  { %1488 = vmatpush1.msra.mxu0 %v3180_v20  ;;  %1559 = vmatpush1.msra.mxu1 %v3186_v24 }
 0x525   :  { %1489 = vmatprep.subr.mxu0 %v3192_v25  ;;  %1560 = vmatprep.subr.mxu1 %v3198_v32 }
 0x526   :  { %1490 = vmatpush1.msra.mxu0 %v3204_v23  ;;  %1561 = vmatpush1.msra.mxu1 %v3210_v29 }
 0x527   :  { %1491 = vmatprep.subr.mxu0 %v3216_v28  ;;  %1562 = vmatprep.subr.mxu1 %v3222_v35 }
 0x528   :  { %1492 = vmatpush1.msra.mxu0 %v3228_v34  ;;  %1563 = vmatpush1.msra.mxu1 %v3234_v42 }
 0x529   :  { %1493 = vmatprep.subr.mxu0 %v3240_v33  ;;  %1564 = vmatprep.subr.mxu1 %v3246_v58 }
 0x52a   :  { %1494 = vmatpush1.msra.mxu0 %v4021_v48  ;;  %1565 = vmatpush1.msra.mxu1 %v4022_v49 }
 0x52b   :  { %1495 = vmatprep.subr.mxu0 %v3264_v63  ;;  %1566 = vmatprep.subr.mxu1 %v3270_v0 }
 0x52c   :  { %1496 = vmatpush1.msra.mxu0 %v3276_v59  ;;  %1567 = vmatpush1.msra.mxu1 %v3282_v62 }
 0x52d   :  { %1497 = vmatprep.subr.mxu0 %v3362_v50  ;;  %1568 = vmatprep.subr.mxu1 %v3368_v52 }
 0x52e   :  { %1498 = vmatpush1.msra.mxu0 %v3374_v53  ;;  %1569 = vmatpush1.msra.mxu1 %v3380_v55 }
 0x52f   :  { %1499 = vmatprep.subr.mxu0 %v3386_v61  ;;  %1570 = vmatprep.subr.mxu1 %v3392_v1 }
 0x530   :  { %1500 = vmatpush1.msra.mxu0 %v3398_v2  ;;  %1571 = vmatpush1.msra.mxu1 %v3404_v4 }
 0x531   :  { %1501 = vmatprep.subr.mxu0 %v3410_v5  ;;  %1572 = vmatprep.subr.mxu1 %v3416_v7 }
 0x532   :  { %1502 = vmatpush1.msra.mxu0 %v3422_v8  ;;  %1573 = vmatpush1.msra.mxu1 %v3428_v9 }
 0x533   :  { %1503 = vmatprep.subr.mxu0 %v3434_v10  ;;  %1574 = vmatprep.subr.mxu1 %v3440_v11 }
 0x534   :  { %1504 = vmatpush1.msra.mxu0 %v3446_v12  ;;  %1575 = vmatpush1.msra.mxu1 %v3452_v13 }
 0x535   :  { %1505 = vmatprep.subr.mxu0 %v3458_v14  ;;  %1576 = vmatprep.subr.mxu1 %v3464_v16 }
 0x536   :  { %1506 = vmatpush1.msra.mxu0 %v3470_v17  ;;  %1577 = vmatpush1.msra.mxu1 %v4044_v57 }
 0x537   :  { %1507 = vmatprep.subr.mxu0 %v4045_v44  ;;  %1578 = vmatprep.subr.mxu1 %v4046_v18  ;;  %v4067_v18 = vld [vmem:[#allocation42_spill] sm:$0xff] }
 0x538   :  { %1508 = vmatpush1.msra.mxu0 %v4047_v19  ;;  %1579 = vmatpush1.msra.mxu1 %v4048_v60  ;;  %v4066_v19 = vld [vmem:[#allocation44_spill] sm:$0xff] }
 0x539   :  { %1509 = vmatprep.subr.mxu0 %v4049_v37  ;;  %1580 = vmatprep.subr.mxu1 %v4050_v46 }
 0x53a   :  { %1510 = vmatpush1.msra.mxu0 %v4051_v45  ;;  %1581 = vmatpush1.msra.mxu1 %v4052_v41  ;;  %v4062_v41 = vld [vmem:[#allocation5_spill] sm:$0xff] }
 0x53b   :  { %1511 = vmatprep.subr.mxu0 %v4053_v39  ;;  %1582 = vmatprep.subr.mxu1 %v4054_v40  ;;  %v4063_v39 = vld [vmem:[#allocation6_spill] sm:$0xff] }
 0x53c   :  { %1512 = vmatpush1.msra.mxu0 %v4055_v43  ;;  %1583 = vmatpush1.msra.mxu1 %v4056_v38  ;;  %v4064_v43 = vld [vmem:[#allocation41_spill] sm:$0xff] }
 0x53d   :  { %1513 = vmatprep.subr.mxu0 %v4057_v36  ;;  %1584 = vmatprep.subr.mxu1 %v4058_v47  ;;  %v4065_v36 = vld [vmem:[#allocation43_spill] sm:$0xff] }
 0x53e   :  { %1514 = vmatpush1.msra.mxu0 %v4059_v56  ;;  %1547 = vmatprep.mubr.f32.mxu0 %v4060_v54 }
 0x53f   :  { %1585 = vmatpush1.msra.mxu1 %v4061_v22  ;;  %1618 = vmatprep.mubr.f32.mxu1 %v4060_v54 }
 0x540   :  { %1657 = vmatprep.subr.mxu0 %v4062_v41  ;;  %1728 = vmatprep.subr.mxu1 %v4063_v39 }
 0x5df   :  { %v1375_v40 = vpop.f32.mrf.mxu0  ;;  %v1446_v47 = vpop.f32.mrf.mxu1 }
 0x5e0   :  { %v1451_v45 = vadd.f32 %v1375_v40, %v4064_v43  ;;  %v1453_v54 = vadd.f32 %v1446_v47, %v4067_v18 }
 0x5e1   :  { %v1377_v38 = vpop.f32.mrf.mxu0  ;;  %v1448_v60 = vpop.f32.mrf.mxu1 }
 0x5e2   :  { %v1966_v46 = vmul.f32 -1.442695, %v1451_v45  ;;  %v1452_v37 = vadd.f32 %v1377_v38, %v4065_v36  ;;  %v1454_v22 = vadd.f32 %v1448_v60, %v4066_v19 }
 0x5e4   :  { %2110 = vpow2.f32 %v1966_v46  ;;  %v1967_v56 = vmul.f32 -1.442695, %v1452_v37  ;;  %v1968_v44 = vmul.f32 -1.442695, %v1454_v22  ;;  %v1841_v22 = vld [vmem:[%s3819_s4 + $0x70] sm:$0xff] }
 0x5e6   :  { %2112 = vpow2.f32 %v1967_v56 }
 0x5e7   :  { %2114 = vtanh.f32 %v1453_v54  ;;  %v1842_v54 = vld [vmem:[%s3819_s4 + $0x78] sm:$0xff] }
 0x5e8   :  { %2116 = vpow2.f32 %v1968_v44 }
 0x5f1   :  { %v2111_v41 = vpop.eup %2110 }
 0x5f2   :  { %v1458_v57 = vadd.f32 1.0, %v2111_v41  ;;  %v1840_v41 = vld [vmem:[%s3819_s4 + $0x68] sm:$0xff] }
 0x5f3   :  { %v2113_v39 = vpop.eup %2112 }
 0x5f4   :  { %2118 = vrcp.f32 %v1458_v57  ;;  %v1464_v40 = vadd.f32 1.0, %v2113_v39  ;;  %v2115_v45 = vpop.eup %2114  ;;  %v1839_v39 = vld [vmem:[%s3819_s4 + $0x60] sm:$0xff] }
 0x5f5   :  { %v2117_v43 = vpop.eup %2116 }
 0x5f6   :  { %2120 = vrcp.f32 %v1464_v40  ;;  %v1471_v36 = vadd.f32 1.0, %v2117_v43  ;;  %v1838_v40 = vld [vmem:[%s3819_s4 + $0x58] sm:$0xff]  ;;  %v1836_v43 = vld [vmem:[%s3819_s4 + $0x48] sm:$0xff] }
 0x5f8   :  { %2122 = vrcp.f32 %v1471_v36  ;;  %v1832_v36 = vld [vmem:[%s3819_s4 + $0x28] sm:$0xff] }
 0x601   :  { %v2119_v46 = vpop.eup %2118 }
 0x602   :  { %v1475_v38 = vmul.f32 %v2119_v46, %v2115_v45  ;;  %v1837_v45 = vld [vmem:[%s3819_s4 + $0x50] sm:$0xff]  ;;  %v1835_v46 = vld [vmem:[%s3819_s4 + $0x40] sm:$0xff] }
 0x603   :  { %v2121_v37 = vpop.eup %2120 }
 0x604   :  { %v1474_v56 = vmul.f32 %v2121_v37, %v3584_v30  ;;  %v1833_v37 = vld [vmem:[%s3819_s4 + $0x30] sm:$0xff] }
 0x605   :  { %v2123_v18 = vpop.eup %2122 }
 0x606   :  { %v3658_v19 = vadd.f32 %v1475_v38, %v1474_v56  ;;  %v1834_v38 = vld [vmem:[%s3819_s4 + $0x38] sm:$0xff]  ;;  %v1831_v56 = vld [vmem:[%s3819_s4 + $0x20] sm:$0xff] }
 0x608   :  { %2124 = vtanh.f32 %v3658_v19 }
 0x615   :  { %v2125_v60 = vpop.eup %2124 }
 0x616   :  { %v1478_v47 = vmul.f32 %v2125_v60, %v2123_v18  ;;  %v1829_v18 = vld [vmem:[%s3819_s4 + $0x10] sm:$0xff]  ;;  %v1828_v60 = vld [vmem:[%s3819_s4 + $0x8] sm:$0xff] }
 0x618   :  { %1548 = vmatmul.mubr.f32.vlgmr.msra.gmra.mxu0 %v1478_v47  ;;  %1619 = vmatmul.mubr.f32.vlgmr.msra.gmra.mxu1 %v1478_v47  ;;  %v1827_v47 = vld [vmem:[%s3819_s4] sm:$0xff] }
 0x619   :  { %1658 = vmatpush1.msra.mxu0 %v3132_v51  ;;  %1729 = vmatpush1.msra.mxu1 %v3138_v31  ;;  %v4068_v51 = vld [vmem:[#allocation4_spill] sm:$0xff]  ;;  %v4069_v31 = vld [vmem:[#allocation25_spill] sm:$0xff] }
 0x61a   :  { %1659 = vmatprep.subr.mxu0 %v3144_v15  ;;  %1730 = vmatprep.subr.mxu1 %v3150_v3  ;;  %v4070_v15 = vld [vmem:[#allocation27_spill] sm:$0xff]  ;;  %v4071_v3 = vld [vmem:[#allocation28_spill] sm:$0xff] }
 0x61b   :  { %1660 = vmatpush1.msra.mxu0 %v3156_v21  ;;  %1731 = vmatpush1.msra.mxu1 %v3162_v6  ;;  %v4072_v21 = vld [vmem:[#allocation26_spill] sm:$0xff]  ;;  %v4073_v6 = vld [vmem:[#allocation8_spill] sm:$0xff] }
 0x61c   :  { %1661 = vmatprep.subr.mxu0 %v3168_v27  ;;  %1732 = vmatprep.subr.mxu1 %v3174_v26  ;;  %v4074_v27 = vld [vmem:[#allocation9_spill] sm:$0xff]  ;;  %v4075_v26 = vld [vmem:[#allocation10_spill] sm:$0xff] }
 0x61d   :  { %1662 = vmatpush1.msra.mxu0 %v3180_v20  ;;  %1733 = vmatpush1.msra.mxu1 %v3186_v24  ;;  %v4076_v20 = vld [vmem:[#allocation11_spill] sm:$0xff]  ;;  %v4077_v24 = vld [vmem:[#allocation12_spill] sm:$0xff] }
 0x61e   :  { %1663 = vmatprep.subr.mxu0 %v3192_v25  ;;  %1734 = vmatprep.subr.mxu1 %v3198_v32  ;;  %v4078_v25 = vld [vmem:[#allocation13_spill] sm:$0xff]  ;;  %v4079_v32 = vld [vmem:[#allocation14_spill] sm:$0xff] }
 0x61f   :  { %1664 = vmatpush1.msra.mxu0 %v3204_v23  ;;  %1735 = vmatpush1.msra.mxu1 %v3210_v29  ;;  %v4080_v23 = vld [vmem:[#allocation15_spill] sm:$0xff]  ;;  %v4081_v29 = vld [vmem:[#allocation16_spill] sm:$0xff] }
 0x620   :  { %1665 = vmatprep.subr.mxu0 %v3216_v28  ;;  %1736 = vmatprep.subr.mxu1 %v3222_v35  ;;  %v4082_v28 = vld [vmem:[#allocation17_spill] sm:$0xff]  ;;  %v4083_v35 = vld [vmem:[#allocation18_spill] sm:$0xff] }
 0x621   :  { %1666 = vmatpush1.msra.mxu0 %v3228_v34  ;;  %1737 = vmatpush1.msra.mxu1 %v3234_v42  ;;  %v4084_v34 = vmov 0.0   ;;  %v4085_v42 = vld [vmem:[#allocation19_spill] sm:$0xff] }
 0x622   :  { %1667 = vmatprep.subr.mxu0 %v3240_v33  ;;  %1738 = vmatprep.subr.mxu1 %v3246_v58  ;;  %v4086_v58 = vld [vmem:[#allocation45_spill] sm:$0xff] }
 0x623   :  { %1668 = vmatpush1.msra.mxu0 %v4021_v48  ;;  %1739 = vmatpush1.msra.mxu1 %v4022_v49 }
 0x624   :  { %1669 = vmatprep.subr.mxu0 %v3264_v63  ;;  %1740 = vmatprep.subr.mxu1 %v3270_v0  ;;  %v4087_v0 = vld [vmem:[#allocation47_spill] sm:$0xff] }
 0x625   :  { %1670 = vmatpush1.msra.mxu0 %v3276_v59  ;;  %1741 = vmatpush1.msra.mxu1 %v3282_v62 }
 0x626   :  { %1671 = vmatprep.subr.mxu0 %v3362_v50  ;;  %1742 = vmatprep.subr.mxu1 %v3368_v52 }
 0x627   :  { %1672 = vmatpush1.msra.mxu0 %v3374_v53  ;;  %1743 = vmatpush1.msra.mxu1 %v3380_v55  ;;  %v4088_v53 = vld [vmem:[#allocation48_spill] sm:$0xff] }
 0x628   :  { %1673 = vmatprep.subr.mxu0 %v3386_v61  ;;  %1744 = vmatprep.subr.mxu1 %v3392_v1  ;;  %v4089_v61 = vld [vmem:[#allocation46_spill] sm:$0xff] }
 0x629   :  { %1674 = vmatpush1.msra.mxu0 %v3398_v2  ;;  %1745 = vmatpush1.msra.mxu1 %v3404_v4 }
 0x62a   :  { %1675 = vmatprep.subr.mxu0 %v3410_v5  ;;  %1746 = vmatprep.subr.mxu1 %v3416_v7 }
 0x62b   :  { %1676 = vmatpush1.msra.mxu0 %v3422_v8  ;;  %1747 = vmatpush1.msra.mxu1 %v3428_v9 }
 0x62c   :  { %1677 = vmatprep.subr.mxu0 %v3434_v10  ;;  %1748 = vmatprep.subr.mxu1 %v3440_v11 }
 0x62d   :  { %1678 = vmatpush1.msra.mxu0 %v3446_v12  ;;  %1749 = vmatpush1.msra.mxu1 %v3452_v13 }
 0x62e   :  { %1679 = vmatprep.subr.mxu0 %v3458_v14  ;;  %1750 = vmatprep.subr.mxu1 %v3464_v16 }
 0x62f   :  { %1680 = vmatpush1.msra.mxu0 %v3470_v17  ;;  %1751 = vmatpush1.msra.mxu1 %v4068_v51 }
 0x630   :  { %1681 = vmatprep.subr.mxu0 %v4069_v31  ;;  %1752 = vmatprep.subr.mxu1 %v4070_v15  ;;  %v4090_v31 = vld [vmem:[#allocation49_spill] sm:$0xff] }
 0x631   :  { %1682 = vmatpush1.msra.mxu0 %v4071_v3  ;;  %1753 = vmatpush1.msra.mxu1 %v4072_v21 }
 0x632   :  { %1683 = vmatprep.subr.mxu0 %v4073_v6  ;;  %1754 = vmatprep.subr.mxu1 %v4074_v27  ;;  %v4091_v6 = vld [vmem:[#allocation51_spill] sm:$0xff] }
 0x633   :  { %1684 = vmatpush1.msra.mxu0 %v4075_v26  ;;  %1755 = vmatpush1.msra.mxu1 %v4076_v20 }
 0x634   :  { %1685 = vmatprep.subr.mxu0 %v4077_v24  ;;  %1756 = vmatprep.subr.mxu1 %v4078_v25  ;;  %v4092_v25 = vld [vmem:[#allocation52_spill] sm:$0xff] }
 0x635   :  { %1686 = vmatpush1.msra.mxu0 %v4079_v32  ;;  %1757 = vmatpush1.msra.mxu1 %v4080_v23  ;;  %v4093_v23 = vld [vmem:[#allocation50_spill] sm:$0xff] }
 0x636   :  { %1687 = vmatprep.subr.mxu0 %v4081_v29  ;;  %1758 = vmatprep.subr.mxu1 %v4082_v28 }
 0x637   :  { %1688 = vmatpush1.msra.mxu0 %v4083_v35  ;;  %1721 = vmatprep.mubr.f32.mxu0 %v4084_v34 }
 0x638   :  { %1759 = vmatpush1.msra.mxu1 %v4085_v42  ;;  %1792 = vmatprep.mubr.f32.mxu1 %v4084_v34 }
 0x639   :  { %1993 = vmatprep.subr.mxu0 %v4084_v34 }
 0x6d8   :  { %v1549_v33 = vpop.f32.mrf.mxu0  ;;  %v1620_v49 = vpop.f32.mrf.mxu1 }
 0x6d9   :  { %v1625_v59 = vadd.f32 %v1549_v33, %v4086_v58  ;;  %v1627_v1 = vadd.f32 %v1620_v49, %v4089_v61  ;;  %v1975_v61 = vld [vmem:[%s3822_s5] ss:$0 sm:$0xff] }
 0x6da   :  { %v1551_v62 = vpop.f32.mrf.mxu0  ;;  %v1622_v52 = vpop.f32.mrf.mxu1 }
 0x6db   :  { %v1969_v63 = vmul.f32 -1.442695, %v1625_v59  ;;  %v1626_v48 = vadd.f32 %v1551_v62, %v4087_v0  ;;  %v1628_v55 = vadd.f32 %v1622_v52, %v4088_v53 }
 0x6dd   :  { %2126 = vpow2.f32 %v1969_v63  ;;  %v1970_v50 = vmul.f32 -1.442695, %v1626_v48  ;;  %v1971_v2 = vmul.f32 -1.442695, %v1628_v55 }
 0x6df   :  { %2128 = vpow2.f32 %v1970_v50 }
 0x6e0   :  { %2130 = vtanh.f32 %v1627_v1 }
 0x6e1   :  { %2132 = vpow2.f32 %v1971_v2 }
 0x6ea   :  { %v2127_v4 = vpop.eup %2126 }
 0x6eb   :  { %v1632_v5 = vadd.f32 1.0, %v2127_v4 }
 0x6ec   :  { %v2129_v7 = vpop.eup %2128 }
 0x6ed   :  { %2134 = vrcp.f32 %v1632_v5  ;;  %v1638_v8 = vadd.f32 1.0, %v2129_v7  ;;  %v2131_v9 = vpop.eup %2130 }
 0x6ee   :  { %v2133_v10 = vpop.eup %2132 }
 0x6ef   :  { %2136 = vrcp.f32 %v1638_v8  ;;  %v1645_v14 = vadd.f32 1.0, %v2133_v10 }
 0x6f1   :  { %2138 = vrcp.f32 %v1645_v14 }
 0x6fa   :  { %v2135_v11 = vpop.eup %2134 }
 0x6fb   :  { %v1649_v12 = vmul.f32 %v2135_v11, %v2131_v9 }
 0x6fc   :  { %v2137_v13 = vpop.eup %2136 }
 0x6fd   :  { %v1648_v16 = vmul.f32 %v2137_v13, %v3658_v19  ;;  %v1830_v19 = vld [vmem:[%s3819_s4 + $0x18] sm:$0xff] }
 0x6fe   :  { %v2139_v30 = vpop.eup %2138 }
 0x6ff   :  { %v3731_v17 = vadd.f32 %v1649_v12, %v1648_v16 }
 0x701   :  { %2140 = vtanh.f32 %v3731_v17 }
 0x70e   :  { %v2141_v57 = vpop.eup %2140 }
 0x70f   :  { %v1652_v44 = vmul.f32 %v2141_v57, %v2139_v30 }
 0x711   :  { %1722 = vmatmul.mubr.f32.vlgmr.msra.gmra.mxu0 %v1652_v44  ;;  %1793 = vmatmul.mubr.f32.vlgmr.msra.gmra.mxu1 %v1652_v44 }
 0x712   :  { %1994 = vmatpush3.msra.mxu0 %v1842_v54  ;;  %2025 = vmatprep.mubr.msk.f32.mxu0 %vm2223_vm1, %v4084_v34 }
 0x713   :  { %1995 = vmatprep.subr.mxu0 %v4084_v34 }
 0x714   :  { %1996 = vmatpush3.msra.mxu0 %v1841_v22 }
 0x715   :  { %1997 = vmatprep.subr.mxu0 %v4084_v34 }
 0x716   :  { %1998 = vmatpush3.msra.mxu0 %v1840_v41 }
 0x717   :  { %1999 = vmatprep.subr.mxu0 %v4084_v34 }
 0x718   :  { %2000 = vmatpush3.msra.mxu0 %v1839_v39 }
 0x719   :  { %2001 = vmatprep.subr.mxu0 %v4084_v34 }
 0x71a   :  { %2002 = vmatpush3.msra.mxu0 %v1838_v40 }
 0x71b   :  { %2003 = vmatprep.subr.mxu0 %v4084_v34 }
 0x71c   :  { %2004 = vmatpush3.msra.mxu0 %v1837_v45 }
 0x71d   :  { %2005 = vmatprep.subr.mxu0 %v4084_v34 }
 0x71e   :  { %2006 = vmatpush3.msra.mxu0 %v1836_v43 }
 0x71f   :  { %2007 = vmatprep.subr.mxu0 %v4084_v34 }
 0x720   :  { %2008 = vmatpush3.msra.mxu0 %v1835_v46 }
 0x721   :  { %2009 = vmatprep.subr.mxu0 %v4084_v34 }
 0x722   :  { %2010 = vmatpush3.msra.mxu0 %v1834_v38 }
 0x723   :  { %2011 = vmatprep.subr.mxu0 %v4084_v34 }
 0x724   :  { %2012 = vmatpush3.msra.mxu0 %v1833_v37 }
 0x725   :  { %2013 = vmatprep.subr.mxu0 %v4084_v34 }
 0x726   :  { %2014 = vmatpush3.msra.mxu0 %v1832_v36 }
 0x727   :  { %2015 = vmatprep.subr.mxu0 %v4084_v34 }
 0x728   :  { %2016 = vmatpush3.msra.mxu0 %v1831_v56 }
 0x729   :  { %2017 = vmatprep.subr.mxu0 %v4084_v34 }
 0x72a   :  { %2018 = vmatpush3.msra.mxu0 %v1830_v19 }
 0x72b   :  { %2019 = vmatprep.subr.mxu0 %v4084_v34 }
 0x72c   :  { %2020 = vmatpush3.msra.mxu0 %v1829_v18 }
 0x72d   :  { %2021 = vmatprep.subr.mxu0 %v4084_v34 }
 0x72e   :  { %2022 = vmatpush3.msra.mxu0 %v1828_v60 }
 0x72f   :  { %2023 = vmatprep.subr.mxu0 %v4084_v34 }
 0x730   :  { %2024 = vmatpush3.msra.mxu0 %v1827_v47 }
 0x7d1   :  { %v1723_v51 = vpop.f32.mrf.mxu0  ;;  %v1794_v26 = vpop.f32.mrf.mxu1 }
 0x7d2   :  { %v1799_v15 = vadd.f32 %v1723_v51, %v4090_v31  ;;  %v1801_v29 = vadd.f32 %v1794_v26, %v4093_v23 }
 0x7d3   :  { %v1725_v3 = vpop.f32.mrf.mxu0  ;;  %v1796_v24 = vpop.f32.mrf.mxu1 }
 0x7d4   :  { %v1972_v21 = vmul.f32 -1.442695, %v1799_v15  ;;  %v1800_v27 = vadd.f32 %v1725_v3, %v4091_v6  ;;  %v1802_v32 = vadd.f32 %v1796_v24, %v4092_v25 }
 0x7d6   :  { %2142 = vpow2.f32 %v1972_v21  ;;  %v1973_v20 = vmul.f32 -1.442695, %v1800_v27  ;;  %v1974_v28 = vmul.f32 -1.442695, %v1802_v32 }
 0x7d8   :  { %2144 = vpow2.f32 %v1973_v20 }
 0x7d9   :  { %2146 = vtanh.f32 %v1801_v29 }
 0x7da   :  { %2148 = vpow2.f32 %v1974_v28 }
 0x7e3   :  { %v2143_v35 = vpop.eup %2142 }
 0x7e4   :  { %v1806_v34 = vadd.f32 1.0, %v2143_v35 }
 0x7e5   :  { %v2145_v42 = vpop.eup %2144 }
 0x7e6   :  { %2150 = vrcp.f32 %v1806_v34  ;;  %v1812_v33 = vadd.f32 1.0, %v2145_v42  ;;  %v2147_v58 = vpop.eup %2146 }
 0x7e7   :  { %v2149_v59 = vpop.eup %2148 }
 0x7e8   :  { %2152 = vrcp.f32 %v1812_v33  ;;  %v1819_v48 = vadd.f32 1.0, %v2149_v59 }
 0x7ea   :  { %2154 = vrcp.f32 %v1819_v48 }
 0x7f3   :  { %v2151_v62 = vpop.eup %2150 }
 0x7f4   :  { %v1823_v63 = vmul.f32 %v2151_v62, %v2147_v58 }
 0x7f5   :  { %v2153_v0 = vpop.eup %2152 }
 0x7f6   :  { %v1822_v49 = vmul.f32 %v2153_v0, %v3731_v17 }
 0x7f7   :  { %v2155_v52 = vpop.eup %2154 }
 0x7f8   :  { %v1824_v50 = vadd.f32 %v1823_v63, %v1822_v49 }
 0x7fa   :  { %1922 = vst [vmem:[%s3820_s8] sm:$0xff] %v1824_v50  ;;  %2156 = vtanh.f32 %v1824_v50 }
 0x807   :  { %v2157_v53 = vpop.eup %2156 }
 0x808   :  { %v1826_v55 = vmul.f32 %v2157_v53, %v2155_v52 }
 0x80a   :  { %2026 = vmatmul.mubr.f32.vlgmr.msra.gmra.mxu0 %v1826_v55  ;;  %1921 = vst [vmem:[%s3821_s7] sm:$0xff] %v1826_v55 }
 0x8ca   :  { %v1916_v1 = vpop.f32.mrf.mxu0 }
 0x8cb   :  { %v1917_v2 = vadd.f32 %v1975_v61, %v1916_v1 }
 0x8cc   :  { %v2027_v4 = vpop.f32.mrf.mxu0 }
 0x8cd   :  { %1920 = vst [vmem:[%s3823_s6] sm:$0xff] %v1917_v2 }

</bundles_post_ra>
